<compile_context>
chip_gen: v6e
topology: v6e:2x2x1
jax: 0.10.0
libtpu: 0.0.40
codegen_flags: <defaults>
</compile_context>

<pallas_src>
import functools
import math

import jax
import jax.numpy as jnp
from jax import lax
from jax.experimental import pallas as pl
from jax.experimental.pallas import tpu as pltpu


# ----------------------------- in-kernel helpers -----------------------------

def _layer_norm(x, w, b, eps=1e-7):
    # x: (R, D) f32, w/b: (1, D) f32 -- PyTorch LayerNorm (biased variance).
    mu = jnp.mean(x, axis=-1, keepdims=True)
    var = jnp.mean((x - mu) ** 2, axis=-1, keepdims=True)
    return (x - mu) * lax.rsqrt(var + eps) * w + b


# --------------------------------- kernel -------------------------------------

def decoder_layer_kernel(num_heads,
                         tgt_ref, mem_ref, qpos_ref, pos_ref,
                         n1w_ref, n1b_ref, sa_qk_ref, sa_v_ref, sa_out_ref,
                         n2w_ref, n2b_ref, ca_q_ref, ca_k_ref, ca_v_ref, ca_out_ref,
                         n3w_ref, n3b_ref, l1w_ref, l1b_ref, l2w_ref, l2b_ref,
                         out_ref):
    D = tgt_ref.shape[-1]
    H = num_heads
    S = D // H

    tgt = tgt_ref[...]      # (N, D) f32 -- this grid step's batch element
    mem = mem_ref[...]      # (M, D) f32
    qpos = qpos_ref[...]    # (N, D) f32
    pos = pos_ref[...]      # (M, D) f32

    def attend(q_b, k_b, v_b, w_out_ref):
        # q_b: (Nq, D) bf16, k_b/v_b: (Nk, D) bf16, heads packed along lanes.
        # w_out_ref: (H, S, D) bf16 per-head out-projection weight slices.
        # Per-head context is folded straight into the output projection and
        # accumulated (full lane-width adds; no masked partial stores).
        out = None
        for h in range(H):                       # static unroll over heads
            sl = slice(h * S, (h + 1) * S)
            # q_h @ k_h^T without materializing a transpose (contract last dims).
            s = lax.dot_general(q_b[:, sl], k_b[:, sl],
                                (((1,), (1,)), ((), ())),
                                preferred_element_type=jnp.float32)
            # score scale already folded into the Q projection weights.
            s = s - jnp.max(s, axis=-1, keepdims=True)
            p = jnp.exp(s)
            p = p / jnp.sum(p, axis=-1, keepdims=True)      # exact softmax (f32)
            ctx = jnp.dot(p.astype(jnp.bfloat16), v_b[:, sl],
                          preferred_element_type=jnp.float32)       # (Nq, S)
            oh = jnp.dot(ctx.astype(jnp.bfloat16), w_out_ref[h],
                         preferred_element_type=jnp.float32)        # (Nq, D)
            out = oh if out is None else out + oh
        return out

    # --- self-attention block ---
    t2 = _layer_norm(tgt, n1w_ref[...], n1b_ref[...])
    q_in = (t2 + qpos).astype(jnp.bfloat16)            # q = k = tgt2 + query_pos
    qk = jnp.dot(q_in, sa_qk_ref[...],
                 preferred_element_type=jnp.float32)   # (N, 2D), fused Q|K proj
    v = jnp.dot(t2.astype(jnp.bfloat16), sa_v_ref[...],
                preferred_element_type=jnp.float32)    # (N, D)
    qk_b = qk.astype(jnp.bfloat16)
    sa = attend(qk_b[:, :D], qk_b[:, D:], v.astype(jnp.bfloat16), sa_out_ref)
    x = tgt + sa                                       # dropout1 identity (eval)

    # --- cross-attention block ---
    t2 = _layer_norm(x, n2w_ref[...], n2b_ref[...])
    cq = jnp.dot((t2 + qpos).astype(jnp.bfloat16), ca_q_ref[...],
                 preferred_element_type=jnp.float32)
    ck = jnp.dot((mem + pos).astype(jnp.bfloat16), ca_k_ref[...],
                 preferred_element_type=jnp.float32)
    cv = jnp.dot(mem.astype(jnp.bfloat16), ca_v_ref[...],
                 preferred_element_type=jnp.float32)
    ca = attend(cq.astype(jnp.bfloat16), ck.astype(jnp.bfloat16),
                cv.astype(jnp.bfloat16), ca_out_ref)
    x = x + ca                                         # dropout2 identity (eval)

    # --- feed-forward block (h1 lives only for this tile, consumed in place) ---
    t2 = _layer_norm(x, n3w_ref[...], n3b_ref[...])
    h1 = jnp.dot(t2.astype(jnp.bfloat16), l1w_ref[...],
                 preferred_element_type=jnp.float32) + l1b_ref[...]
    h1 = jnp.maximum(h1, 0.0)                          # ReLU; inner dropout identity
    ff = jnp.dot(h1.astype(jnp.bfloat16), l2w_ref[...],
                 preferred_element_type=jnp.float32) + l2b_ref[...]
    out_ref[...] = x + ff                              # dropout3 identity (eval)


# --------------------------------- wrapper -------------------------------------

def transformer_decoder_layer(tgt, memory, params, num_heads,
                              pos=None, query_pos=None):
    B, N, D = tgt.shape
    M = memory.shape[1]
    S = D // num_heads
    F_dim = params[10].shape[0]          # dim_feedforward (linear1 is (F, D))

    if query_pos is None:
        query_pos = jnp.zeros_like(tgt)
    if pos is None:
        pos = jnp.zeros_like(memory)

    (n1w, n1b, sa_in, sa_out, n2w, n2b, ca_in, ca_out,
     n3w, n3b, l1w, l1b, l2w, l2b) = params

    scores_mul = 1.0 / math.sqrt(float(S))
    bf16 = jnp.bfloat16

    # Pre-transpose weights once into (K, N) layout, cast to bf16, fold the
    # 1/sqrt(head_dim) scale into the Q projections, split out-proj per head.
    wq_s = (sa_in[:D, :].T * scores_mul)                 # (D, D), scale folded
    wk_s = sa_in[D:2 * D, :].T                           # (D, D)
    sa_qk_t = jnp.concatenate([wq_s, wk_s], axis=1).astype(bf16)   # (D, 2D)
    sa_v_t = sa_in[2 * D:, :].T.astype(bf16)                        # (D, D)
    sa_out_h = sa_out.T.reshape(num_heads, S, D).astype(bf16)       # (H, S, D)

    ca_q_t = (ca_in[:D, :].T * scores_mul).astype(bf16)             # (D, D)
    ca_k_t = ca_in[D:2 * D, :].T.astype(bf16)                       # (D, D)
    ca_v_t = ca_in[2 * D:, :].T.astype(bf16)                        # (D, D)
    ca_out_h = ca_out.T.reshape(num_heads, S, D).astype(bf16)       # (H, S, D)

    l1w_t = l1w.T.astype(bf16)                                      # (D, F)
    l2w_t = l2w.T.astype(bf16)                                      # (F, D)

    operands = (tgt, memory, query_pos, pos,
                n1w, n1b, sa_qk_t, sa_v_t, sa_out_h,
                n2w, n2b, ca_q_t, ca_k_t, ca_v_t, ca_out_h,
                n3w, n3b, l1w_t, l1b, l2w_t, l2b)

    # One batch element per grid step; weights use constant index maps so they
    # stay VMEM-resident across steps (Pallas skips the DMA when the block
    # index does not change).
    in_specs = [
        pl.BlockSpec((None, N, D), lambda b: (b, 0, 0)),      # tgt
        pl.BlockSpec((None, M, D), lambda b: (b, 0, 0)),      # memory
        pl.BlockSpec((None, N, D), lambda b: (b, 0, 0)),      # query_pos
        pl.BlockSpec((None, M, D), lambda b: (b, 0, 0)),      # pos
        pl.BlockSpec((1, D), lambda b: (0, 0)),               # norm1 w
        pl.BlockSpec((1, D), lambda b: (0, 0)),               # norm1 b
        pl.BlockSpec((D, 2 * D), lambda b: (0, 0)),           # self-attn Q|K
        pl.BlockSpec((D, D), lambda b: (0, 0)),               # self-attn V
        pl.BlockSpec((num_heads, S, D), lambda b: (0, 0, 0)), # self-attn out (per head)
        pl.BlockSpec((1, D), lambda b: (0, 0)),               # norm2 w
        pl.BlockSpec((1, D), lambda b: (0, 0)),               # norm2 b
        pl.BlockSpec((D, D), lambda b: (0, 0)),               # cross-attn Q
        pl.BlockSpec((D, D), lambda b: (0, 0)),               # cross-attn K
        pl.BlockSpec((D, D), lambda b: (0, 0)),               # cross-attn V
        pl.BlockSpec((num_heads, S, D), lambda b: (0, 0, 0)), # cross-attn out (per head)
        pl.BlockSpec((1, D), lambda b: (0, 0)),               # norm3 w
        pl.BlockSpec((1, D), lambda b: (0, 0)),               # norm3 b
        pl.BlockSpec((D, F_dim), lambda b: (0, 0)),           # linear1 W^T
        pl.BlockSpec((1, F_dim), lambda b: (0, 0)),           # linear1 b
        pl.BlockSpec((F_dim, D), lambda b: (0, 0)),           # linear2 W^T
        pl.BlockSpec((1, D), lambda b: (0, 0)),               # linear2 b
    ]

    out = pl.pallas_call(
        functools.partial(decoder_layer_kernel, num_heads),
        out_shape=jax.ShapeDtypeStruct((B, N, D), jnp.float32),
        grid=(B,),
        in_specs=in_specs,
        out_specs=pl.BlockSpec((None, N, D), lambda b: (b, 0, 0)),
        compiler_params=pltpu.CompilerParams(
            dimension_semantics=("parallel",)),
    )(*operands)

    return out


# ------------------------------ pure-JAX reference -----------------------------

def _ref_layer(tgt, memory, qpos, pos, params, num_heads):
    (n1w, n1b, sa_in, sa_out, n2w, n2b, ca_in, ca_out,
     n3w, n3b, l1w, l1b, l2w, l2b) = params

    def ln(x, w, b):
        mu = x.mean(-1, keepdims=True)
        var = ((x - mu) ** 2).mean(-1, keepdims=True)
        return (x - mu) / jnp.sqrt(var + 1e-7) * w + b

    def mha(q, k, v, in_proj, out_proj):
        B, _, D = q.shape
        S = D // num_heads
        wq, wk, wv = in_proj[:D], in_proj[D:2 * D], in_proj[2 * D:]
        qp, kp, vp = q @ wq.T, k @ wk.T, v @ wv.T
        qh = qp.reshape(B, -1, num_heads, S).transpose(0, 2, 1, 3)
        kh = kp.reshape(B, -1, num_heads, S).transpose(0, 2, 1, 3)
        vh = vp.reshape(B, -1, num_heads, S).transpose(0, 2, 1, 3)
        sc = jnp.einsum('bhns,bhms->bhnm', qh, kh) / math.sqrt(S)
        pr = jax.nn.softmax(sc, axis=-1)
        ctx = jnp.einsum('bhnm,bhms->bhns', pr, vh)
        ctx = ctx.transpose(0, 2, 1, 3).reshape(B, -1, D)
        return ctx @ out_proj.T

    t2 = ln(tgt, n1w, n1b)
    x = tgt + mha(t2 + qpos, t2 + qpos, t2, sa_in, sa_out)
    t2 = ln(x, n2w, n2b)
    x = x + mha(t2 + qpos, memory + pos, memory, ca_in, ca_out)
    t2 = ln(x, n3w, n3b)
    ff = jnp.maximum(t2 @ l1w.T + l1b, 0.0) @ l2w.T + l2b
    return x + ff


# ----------------------------------- main --------------------------------------

if __name__ == "__main__":
    B, N, M = 2, 8, 8
    d_model, nhead, dim_ff = 32, 4, 64

    key = jax.random.PRNGKey(0)
    ks = jax.random.split(key, 12)

    tgt = jax.random.normal(ks[0], (B, N, d_model), jnp.float32)
    memory = jax.random.normal(ks[1], (B, M, d_model), jnp.float32)

    scale = 0.02
    params = (
        jnp.ones((1, d_model), jnp.float32),                               # norm1 w
        jnp.zeros((1, d_model), jnp.float32),                              # norm1 b
        scale * jax.random.normal(ks[2], (3 * d_model, d_model)),          # self-attn in_proj
        scale * jax.random.normal(ks[3], (d_model, d_model)),              # self-attn out_proj
        jnp.ones((1, d_model), jnp.float32),                               # norm2 w
        jnp.zeros((1, d_model), jnp.float32),                              # norm2 b
        scale * jax.random.normal(ks[4], (3 * d_model, d_model)),          # cross-attn in_proj
        scale * jax.random.normal(ks[5], (d_model, d_model)),              # cross-attn out_proj
        jnp.ones((1, d_model), jnp.float32),                               # norm3 w
        jnp.zeros((1, d_model), jnp.float32),                              # norm3 b
        scale * jax.random.normal(ks[6], (dim_ff, d_model)),               # linear1 W
        scale * jax.random.normal(ks[7], (1, dim_ff)),                     # linear1 b
        scale * jax.random.normal(ks[8], (d_model, dim_ff)),               # linear2 W
        scale * jax.random.normal(ks[9], (1, d_model)),                    # linear2 b
    )
    params = tuple(p.astype(jnp.float32) for p in params)

    out = transformer_decoder_layer(tgt, memory, params, nhead)
    out = jax.block_until_ready(out)

    ref = _ref_layer(tgt, memory, jnp.zeros_like(tgt), jnp.zeros_like(memory),
                     params, nhead)
    assert out.shape == (B, N, d_model)
    # bf16 MXU operands (f32 accumulation) => slightly looser tolerance than
    # the pure-f32 reference.
    assert jnp.allclose(out, ref, atol=2e-3, rtol=2e-2), \
        f"max err {jnp.max(jnp.abs(out - ref))}"

    print("KERNEL_OK")
</pallas_src>

<mosaic_0001>
module attributes {stable_mosaic.version = 11 : i64} {
  func.func @decoder_layer_kernel(%arg0: i32, %arg1: memref<1x8x32xf32, #tpu.memory_space<vmem>>, %arg2: memref<1x8x32xf32, #tpu.memory_space<vmem>>, %arg3: memref<1x8x32xf32, #tpu.memory_space<vmem>>, %arg4: memref<1x8x32xf32, #tpu.memory_space<vmem>>, %arg5: memref<1x32xf32, #tpu.memory_space<vmem>>, %arg6: memref<1x32xf32, #tpu.memory_space<vmem>>, %arg7: memref<32x64xbf16, #tpu.memory_space<vmem>>, %arg8: memref<32x32xbf16, #tpu.memory_space<vmem>>, %arg9: memref<4x8x32xbf16, #tpu.memory_space<vmem>>, %arg10: memref<1x32xf32, #tpu.memory_space<vmem>>, %arg11: memref<1x32xf32, #tpu.memory_space<vmem>>, %arg12: memref<32x32xbf16, #tpu.memory_space<vmem>>, %arg13: memref<32x32xbf16, #tpu.memory_space<vmem>>, %arg14: memref<32x32xbf16, #tpu.memory_space<vmem>>, %arg15: memref<4x8x32xbf16, #tpu.memory_space<vmem>>, %arg16: memref<1x32xf32, #tpu.memory_space<vmem>>, %arg17: memref<1x32xf32, #tpu.memory_space<vmem>>, %arg18: memref<32x64xbf16, #tpu.memory_space<vmem>>, %arg19: memref<1x64xf32, #tpu.memory_space<vmem>>, %arg20: memref<64x32xbf16, #tpu.memory_space<vmem>>, %arg21: memref<1x32xf32, #tpu.memory_space<vmem>>, %arg22: memref<1x8x32xf32, #tpu.memory_space<vmem>>) attributes {dimension_semantics = [#tpu.dimension_semantics<parallel>], iteration_bounds = array<i64: 2>, scalar_prefetch = 0 : i64, scratch_operands = 0 : i64, tpu.core_type = #tpu.core_type<tc>, window_params = [{transform_indices = @transform_0, window_bounds = array<i64: 1, 8, 32>}, {transform_indices = @transform_1, window_bounds = array<i64: 1, 8, 32>}, {transform_indices = @transform_2, window_bounds = array<i64: 1, 8, 32>}, {transform_indices = @transform_3, window_bounds = array<i64: 1, 8, 32>}, {pipeline_mode = #tpu.pipeline_mode<synchronous>, transform_indices = @transform_4, window_bounds = array<i64: 1, 32>}, {pipeline_mode = #tpu.pipeline_mode<synchronous>, transform_indices = @transform_5, window_bounds = array<i64: 1, 32>}, {pipeline_mode = #tpu.pipeline_mode<synchronous>, transform_indices = @transform_6, window_bounds = array<i64: 32, 64>}, {pipeline_mode = #tpu.pipeline_mode<synchronous>, transform_indices = @transform_7, window_bounds = array<i64: 32, 32>}, {pipeline_mode = #tpu.pipeline_mode<synchronous>, transform_indices = @transform_8, window_bounds = array<i64: 4, 8, 32>}, {pipeline_mode = #tpu.pipeline_mode<synchronous>, transform_indices = @transform_9, window_bounds = array<i64: 1, 32>}, {pipeline_mode = #tpu.pipeline_mode<synchronous>, transform_indices = @transform_10, window_bounds = array<i64: 1, 32>}, {pipeline_mode = #tpu.pipeline_mode<synchronous>, transform_indices = @transform_11, window_bounds = array<i64: 32, 32>}, {pipeline_mode = #tpu.pipeline_mode<synchronous>, transform_indices = @transform_12, window_bounds = array<i64: 32, 32>}, {pipeline_mode = #tpu.pipeline_mode<synchronous>, transform_indices = @transform_13, window_bounds = array<i64: 32, 32>}, {pipeline_mode = #tpu.pipeline_mode<synchronous>, transform_indices = @transform_14, window_bounds = array<i64: 4, 8, 32>}, {pipeline_mode = #tpu.pipeline_mode<synchronous>, transform_indices = @transform_15, window_bounds = array<i64: 1, 32>}, {pipeline_mode = #tpu.pipeline_mode<synchronous>, transform_indices = @transform_16, window_bounds = array<i64: 1, 32>}, {pipeline_mode = #tpu.pipeline_mode<synchronous>, transform_indices = @transform_17, window_bounds = array<i64: 32, 64>}, {pipeline_mode = #tpu.pipeline_mode<synchronous>, transform_indices = @transform_18, window_bounds = array<i64: 1, 64>}, {pipeline_mode = #tpu.pipeline_mode<synchronous>, transform_indices = @transform_19, window_bounds = array<i64: 64, 32>}, {pipeline_mode = #tpu.pipeline_mode<synchronous>, transform_indices = @transform_20, window_bounds = array<i64: 1, 32>}, {transform_indices = @transform_21, window_bounds = array<i64: 1, 8, 32>}]} {
    %c0 = arith.constant 0 : index
    %c0_0 = arith.constant 0 : index
    %c0_1 = arith.constant 0 : index
    %0 = vector.load %arg1[%c0, %c0_0, %c0_1] : memref<1x8x32xf32, #tpu.memory_space<vmem>>, vector<1x8x32xf32>
    %1 = vector.shape_cast %0 : vector<1x8x32xf32> to vector<8x32xf32>
    %c0_2 = arith.constant 0 : index
    %c0_3 = arith.constant 0 : index
    %c0_4 = arith.constant 0 : index
    %2 = vector.load %arg2[%c0_2, %c0_3, %c0_4] : memref<1x8x32xf32, #tpu.memory_space<vmem>>, vector<1x8x32xf32>
    %3 = vector.shape_cast %2 : vector<1x8x32xf32> to vector<8x32xf32>
    %c0_5 = arith.constant 0 : index
    %c0_6 = arith.constant 0 : index
    %c0_7 = arith.constant 0 : index
    %4 = vector.load %arg3[%c0_5, %c0_6, %c0_7] : memref<1x8x32xf32, #tpu.memory_space<vmem>>, vector<1x8x32xf32>
    %5 = vector.shape_cast %4 : vector<1x8x32xf32> to vector<8x32xf32>
    %c0_8 = arith.constant 0 : index
    %c0_9 = arith.constant 0 : index
    %c0_10 = arith.constant 0 : index
    %6 = vector.load %arg4[%c0_8, %c0_9, %c0_10] : memref<1x8x32xf32, #tpu.memory_space<vmem>>, vector<1x8x32xf32>
    %7 = vector.shape_cast %6 : vector<1x8x32xf32> to vector<8x32xf32>
    %c0_11 = arith.constant 0 : index
    %c0_12 = arith.constant 0 : index
    %8 = vector.load %arg5[%c0_11, %c0_12] : memref<1x32xf32, #tpu.memory_space<vmem>>, vector<1x32xf32>
    %c0_13 = arith.constant 0 : index
    %c0_14 = arith.constant 0 : index
    %9 = vector.load %arg6[%c0_13, %c0_14] : memref<1x32xf32, #tpu.memory_space<vmem>>, vector<1x32xf32>
    %cst = arith.constant dense<0.000000e+00> : vector<8xf32>
    %10 = vector.multi_reduction <add>, %1, %cst [1] : vector<8x32xf32> to vector<8xf32>
    %11 = vector.shape_cast %10 : vector<8xf32> to vector<8x1xf32>
    %cst_15 = arith.constant 3.200000e+01 : f32
    %12 = vector.broadcast %cst_15 : f32 to vector<8x1xf32>
    %13 = arith.divf %11, %12 : vector<8x1xf32>
    %14 = vector.broadcast %13 : vector<8x1xf32> to vector<8x32xf32>
    %15 = arith.subf %1, %14 : vector<8x32xf32>
    %16 = arith.mulf %15, %15 : vector<8x32xf32>
    %cst_16 = arith.constant dense<0.000000e+00> : vector<8xf32>
    %17 = vector.multi_reduction <add>, %16, %cst_16 [1] : vector<8x32xf32> to vector<8xf32>
    %18 = vector.shape_cast %17 : vector<8xf32> to vector<8x1xf32>
    %cst_17 = arith.constant 3.200000e+01 : f32
    %19 = vector.broadcast %cst_17 : f32 to vector<8x1xf32>
    %20 = arith.divf %18, %19 : vector<8x1xf32>
    %21 = vector.broadcast %13 : vector<8x1xf32> to vector<8x32xf32>
    %22 = arith.subf %1, %21 : vector<8x32xf32>
    %cst_18 = arith.constant 1.000000e-07 : f32
    %23 = vector.broadcast %cst_18 : f32 to vector<8x1xf32>
    %24 = arith.addf %20, %23 : vector<8x1xf32>
    %25 = math.rsqrt %24 : vector<8x1xf32>
    %26 = vector.broadcast %25 : vector<8x1xf32> to vector<8x32xf32>
    %27 = arith.mulf %22, %26 : vector<8x32xf32>
    %28 = vector.broadcast %8 : vector<1x32xf32> to vector<8x32xf32>
    %29 = arith.mulf %27, %28 : vector<8x32xf32>
    %30 = vector.broadcast %9 : vector<1x32xf32> to vector<8x32xf32>
    %31 = arith.addf %29, %30 : vector<8x32xf32>
    %32 = arith.addf %31, %5 : vector<8x32xf32>
    %33 = arith.truncf %32 : vector<8x32xf32> to vector<8x32xbf16>
    %c0_19 = arith.constant 0 : index
    %c0_20 = arith.constant 0 : index
    %34 = vector.load %arg7[%c0_19, %c0_20] : memref<32x64xbf16, #tpu.memory_space<vmem>>, vector<32x64xbf16>
    %cst_21 = arith.constant dense<0.000000e+00> : vector<8x64xf32>
    %35 = tpu.matmul %33, %34, %cst_21 {dimension_numbers = #tpu.dot_dimension_numbers<[1], [0], [0], [1], [0, 0, 1, 1], [], []>} : vector<8x32xbf16>, vector<32x64xbf16>, vector<8x64xf32> -> vector<8x64xf32>
    %36 = arith.truncf %31 : vector<8x32xf32> to vector<8x32xbf16>
    %c0_22 = arith.constant 0 : index
    %c0_23 = arith.constant 0 : index
    %37 = vector.load %arg8[%c0_22, %c0_23] : memref<32x32xbf16, #tpu.memory_space<vmem>>, vector<32x32xbf16>
    %cst_24 = arith.constant dense<0.000000e+00> : vector<8x32xf32>
    %38 = tpu.matmul %36, %37, %cst_24 {dimension_numbers = #tpu.dot_dimension_numbers<[1], [0], [0], [1], [0, 0, 1, 1], [], []>} : vector<8x32xbf16>, vector<32x32xbf16>, vector<8x32xf32> -> vector<8x32xf32>
    %39 = arith.truncf %35 : vector<8x64xf32> to vector<8x64xbf16>
    %40 = vector.extract_strided_slice %39 {offsets = [0, 0], sizes = [8, 32], strides = [1, 1]} : vector<8x64xbf16> to vector<8x32xbf16>
    %41 = vector.extract_strided_slice %39 {offsets = [0, 32], sizes = [8, 32], strides = [1, 1]} : vector<8x64xbf16> to vector<8x32xbf16>
    %42 = arith.truncf %38 : vector<8x32xf32> to vector<8x32xbf16>
    %43 = vector.extract_strided_slice %40 {offsets = [0, 0], sizes = [8, 8], strides = [1, 1]} : vector<8x32xbf16> to vector<8x8xbf16>
    %44 = vector.extract_strided_slice %41 {offsets = [0, 0], sizes = [8, 8], strides = [1, 1]} : vector<8x32xbf16> to vector<8x8xbf16>
    %cst_25 = arith.constant dense<0.000000e+00> : vector<8x8xf32>
    %45 = tpu.matmul %43, %44, %cst_25 {dimension_numbers = #tpu.dot_dimension_numbers<[1], [1], [0], [0], [0, 0, 1, 0], [], []>} : vector<8x8xbf16>, vector<8x8xbf16>, vector<8x8xf32> -> vector<8x8xf32>
    %cst_26 = arith.constant dense<0xFF800000> : vector<8xf32>
    %46 = vector.multi_reduction <maximumf>, %45, %cst_26 [1] : vector<8x8xf32> to vector<8xf32>
    %47 = vector.shape_cast %46 : vector<8xf32> to vector<8x1xf32>
    %48 = vector.broadcast %47 : vector<8x1xf32> to vector<8x8xf32>
    %49 = arith.subf %45, %48 : vector<8x8xf32>
    %50 = math.exp %49 : vector<8x8xf32>
    %cst_27 = arith.constant dense<0.000000e+00> : vector<8xf32>
    %51 = vector.multi_reduction <add>, %50, %cst_27 [1] : vector<8x8xf32> to vector<8xf32>
    %52 = vector.shape_cast %51 : vector<8xf32> to vector<8x1xf32>
    %53 = vector.broadcast %52 : vector<8x1xf32> to vector<8x8xf32>
    %54 = arith.divf %50, %53 : vector<8x8xf32>
    %55 = arith.truncf %54 : vector<8x8xf32> to vector<8x8xbf16>
    %56 = vector.extract_strided_slice %42 {offsets = [0, 0], sizes = [8, 8], strides = [1, 1]} : vector<8x32xbf16> to vector<8x8xbf16>
    %cst_28 = arith.constant dense<0.000000e+00> : vector<8x8xf32>
    %57 = tpu.matmul %55, %56, %cst_28 {dimension_numbers = #tpu.dot_dimension_numbers<[1], [0], [0], [1], [0, 0, 1, 1], [], []>} : vector<8x8xbf16>, vector<8x8xbf16>, vector<8x8xf32> -> vector<8x8xf32>
    %58 = arith.truncf %57 : vector<8x8xf32> to vector<8x8xbf16>
    %c0_29 = arith.constant 0 : index
    %c0_30 = arith.constant 0 : index
    %c0_31 = arith.constant 0 : index
    %59 = vector.load %arg9[%c0_29, %c0_30, %c0_31] : memref<4x8x32xbf16, #tpu.memory_space<vmem>>, vector<1x8x32xbf16>
    %60 = vector.shape_cast %59 : vector<1x8x32xbf16> to vector<8x32xbf16>
    %cst_32 = arith.constant dense<0.000000e+00> : vector<8x32xf32>
    %61 = tpu.matmul %58, %60, %cst_32 {dimension_numbers = #tpu.dot_dimension_numbers<[1], [0], [0], [1], [0, 0, 1, 1], [], []>} : vector<8x8xbf16>, vector<8x32xbf16>, vector<8x32xf32> -> vector<8x32xf32>
    %62 = vector.extract_strided_slice %40 {offsets = [0, 8], sizes = [8, 8], strides = [1, 1]} : vector<8x32xbf16> to vector<8x8xbf16>
    %63 = vector.extract_strided_slice %41 {offsets = [0, 8], sizes = [8, 8], strides = [1, 1]} : vector<8x32xbf16> to vector<8x8xbf16>
    %cst_33 = arith.constant dense<0.000000e+00> : vector<8x8xf32>
    %64 = tpu.matmul %62, %63, %cst_33 {dimension_numbers = #tpu.dot_dimension_numbers<[1], [1], [0], [0], [0, 0, 1, 0], [], []>} : vector<8x8xbf16>, vector<8x8xbf16>, vector<8x8xf32> -> vector<8x8xf32>
    %cst_34 = arith.constant dense<0xFF800000> : vector<8xf32>
    %65 = vector.multi_reduction <maximumf>, %64, %cst_34 [1] : vector<8x8xf32> to vector<8xf32>
    %66 = vector.shape_cast %65 : vector<8xf32> to vector<8x1xf32>
    %67 = vector.broadcast %66 : vector<8x1xf32> to vector<8x8xf32>
    %68 = arith.subf %64, %67 : vector<8x8xf32>
    %69 = math.exp %68 : vector<8x8xf32>
    %cst_35 = arith.constant dense<0.000000e+00> : vector<8xf32>
    %70 = vector.multi_reduction <add>, %69, %cst_35 [1] : vector<8x8xf32> to vector<8xf32>
    %71 = vector.shape_cast %70 : vector<8xf32> to vector<8x1xf32>
    %72 = vector.broadcast %71 : vector<8x1xf32> to vector<8x8xf32>
    %73 = arith.divf %69, %72 : vector<8x8xf32>
    %74 = arith.truncf %73 : vector<8x8xf32> to vector<8x8xbf16>
    %75 = vector.extract_strided_slice %42 {offsets = [0, 8], sizes = [8, 8], strides = [1, 1]} : vector<8x32xbf16> to vector<8x8xbf16>
    %cst_36 = arith.constant dense<0.000000e+00> : vector<8x8xf32>
    %76 = tpu.matmul %74, %75, %cst_36 {dimension_numbers = #tpu.dot_dimension_numbers<[1], [0], [0], [1], [0, 0, 1, 1], [], []>} : vector<8x8xbf16>, vector<8x8xbf16>, vector<8x8xf32> -> vector<8x8xf32>
    %77 = arith.truncf %76 : vector<8x8xf32> to vector<8x8xbf16>
    %c1 = arith.constant 1 : index
    %c0_37 = arith.constant 0 : index
    %c0_38 = arith.constant 0 : index
    %78 = vector.load %arg9[%c1, %c0_37, %c0_38] : memref<4x8x32xbf16, #tpu.memory_space<vmem>>, vector<1x8x32xbf16>
    %79 = vector.shape_cast %78 : vector<1x8x32xbf16> to vector<8x32xbf16>
    %cst_39 = arith.constant dense<0.000000e+00> : vector<8x32xf32>
    %80 = tpu.matmul %77, %79, %cst_39 {dimension_numbers = #tpu.dot_dimension_numbers<[1], [0], [0], [1], [0, 0, 1, 1], [], []>} : vector<8x8xbf16>, vector<8x32xbf16>, vector<8x32xf32> -> vector<8x32xf32>
    %81 = arith.addf %61, %80 : vector<8x32xf32>
    %82 = vector.extract_strided_slice %40 {offsets = [0, 16], sizes = [8, 8], strides = [1, 1]} : vector<8x32xbf16> to vector<8x8xbf16>
    %83 = vector.extract_strided_slice %41 {offsets = [0, 16], sizes = [8, 8], strides = [1, 1]} : vector<8x32xbf16> to vector<8x8xbf16>
    %cst_40 = arith.constant dense<0.000000e+00> : vector<8x8xf32>
    %84 = tpu.matmul %82, %83, %cst_40 {dimension_numbers = #tpu.dot_dimension_numbers<[1], [1], [0], [0], [0, 0, 1, 0], [], []>} : vector<8x8xbf16>, vector<8x8xbf16>, vector<8x8xf32> -> vector<8x8xf32>
    %cst_41 = arith.constant dense<0xFF800000> : vector<8xf32>
    %85 = vector.multi_reduction <maximumf>, %84, %cst_41 [1] : vector<8x8xf32> to vector<8xf32>
    %86 = vector.shape_cast %85 : vector<8xf32> to vector<8x1xf32>
    %87 = vector.broadcast %86 : vector<8x1xf32> to vector<8x8xf32>
    %88 = arith.subf %84, %87 : vector<8x8xf32>
    %89 = math.exp %88 : vector<8x8xf32>
    %cst_42 = arith.constant dense<0.000000e+00> : vector<8xf32>
    %90 = vector.multi_reduction <add>, %89, %cst_42 [1] : vector<8x8xf32> to vector<8xf32>
    %91 = vector.shape_cast %90 : vector<8xf32> to vector<8x1xf32>
    %92 = vector.broadcast %91 : vector<8x1xf32> to vector<8x8xf32>
    %93 = arith.divf %89, %92 : vector<8x8xf32>
    %94 = arith.truncf %93 : vector<8x8xf32> to vector<8x8xbf16>
    %95 = vector.extract_strided_slice %42 {offsets = [0, 16], sizes = [8, 8], strides = [1, 1]} : vector<8x32xbf16> to vector<8x8xbf16>
    %cst_43 = arith.constant dense<0.000000e+00> : vector<8x8xf32>
    %96 = tpu.matmul %94, %95, %cst_43 {dimension_numbers = #tpu.dot_dimension_numbers<[1], [0], [0], [1], [0, 0, 1, 1], [], []>} : vector<8x8xbf16>, vector<8x8xbf16>, vector<8x8xf32> -> vector<8x8xf32>
    %97 = arith.truncf %96 : vector<8x8xf32> to vector<8x8xbf16>
    %c2 = arith.constant 2 : index
    %c0_44 = arith.constant 0 : index
    %c0_45 = arith.constant 0 : index
    %98 = vector.load %arg9[%c2, %c0_44, %c0_45] : memref<4x8x32xbf16, #tpu.memory_space<vmem>>, vector<1x8x32xbf16>
    %99 = vector.shape_cast %98 : vector<1x8x32xbf16> to vector<8x32xbf16>
    %cst_46 = arith.constant dense<0.000000e+00> : vector<8x32xf32>
    %100 = tpu.matmul %97, %99, %cst_46 {dimension_numbers = #tpu.dot_dimension_numbers<[1], [0], [0], [1], [0, 0, 1, 1], [], []>} : vector<8x8xbf16>, vector<8x32xbf16>, vector<8x32xf32> -> vector<8x32xf32>
    %101 = arith.addf %81, %100 : vector<8x32xf32>
    %102 = vector.extract_strided_slice %40 {offsets = [0, 24], sizes = [8, 8], strides = [1, 1]} : vector<8x32xbf16> to vector<8x8xbf16>
    %103 = vector.extract_strided_slice %41 {offsets = [0, 24], sizes = [8, 8], strides = [1, 1]} : vector<8x32xbf16> to vector<8x8xbf16>
    %cst_47 = arith.constant dense<0.000000e+00> : vector<8x8xf32>
    %104 = tpu.matmul %102, %103, %cst_47 {dimension_numbers = #tpu.dot_dimension_numbers<[1], [1], [0], [0], [0, 0, 1, 0], [], []>} : vector<8x8xbf16>, vector<8x8xbf16>, vector<8x8xf32> -> vector<8x8xf32>
    %cst_48 = arith.constant dense<0xFF800000> : vector<8xf32>
    %105 = vector.multi_reduction <maximumf>, %104, %cst_48 [1] : vector<8x8xf32> to vector<8xf32>
    %106 = vector.shape_cast %105 : vector<8xf32> to vector<8x1xf32>
    %107 = vector.broadcast %106 : vector<8x1xf32> to vector<8x8xf32>
    %108 = arith.subf %104, %107 : vector<8x8xf32>
    %109 = math.exp %108 : vector<8x8xf32>
    %cst_49 = arith.constant dense<0.000000e+00> : vector<8xf32>
    %110 = vector.multi_reduction <add>, %109, %cst_49 [1] : vector<8x8xf32> to vector<8xf32>
    %111 = vector.shape_cast %110 : vector<8xf32> to vector<8x1xf32>
    %112 = vector.broadcast %111 : vector<8x1xf32> to vector<8x8xf32>
    %113 = arith.divf %109, %112 : vector<8x8xf32>
    %114 = arith.truncf %113 : vector<8x8xf32> to vector<8x8xbf16>
    %115 = vector.extract_strided_slice %42 {offsets = [0, 24], sizes = [8, 8], strides = [1, 1]} : vector<8x32xbf16> to vector<8x8xbf16>
    %cst_50 = arith.constant dense<0.000000e+00> : vector<8x8xf32>
    %116 = tpu.matmul %114, %115, %cst_50 {dimension_numbers = #tpu.dot_dimension_numbers<[1], [0], [0], [1], [0, 0, 1, 1], [], []>} : vector<8x8xbf16>, vector<8x8xbf16>, vector<8x8xf32> -> vector<8x8xf32>
    %117 = arith.truncf %116 : vector<8x8xf32> to vector<8x8xbf16>
    %c3 = arith.constant 3 : index
    %c0_51 = arith.constant 0 : index
    %c0_52 = arith.constant 0 : index
    %118 = vector.load %arg9[%c3, %c0_51, %c0_52] : memref<4x8x32xbf16, #tpu.memory_space<vmem>>, vector<1x8x32xbf16>
    %119 = vector.shape_cast %118 : vector<1x8x32xbf16> to vector<8x32xbf16>
    %cst_53 = arith.constant dense<0.000000e+00> : vector<8x32xf32>
    %120 = tpu.matmul %117, %119, %cst_53 {dimension_numbers = #tpu.dot_dimension_numbers<[1], [0], [0], [1], [0, 0, 1, 1], [], []>} : vector<8x8xbf16>, vector<8x32xbf16>, vector<8x32xf32> -> vector<8x32xf32>
    %121 = arith.addf %101, %120 : vector<8x32xf32>
    %122 = arith.addf %1, %121 : vector<8x32xf32>
    %c0_54 = arith.constant 0 : index
    %c0_55 = arith.constant 0 : index
    %123 = vector.load %arg10[%c0_54, %c0_55] : memref<1x32xf32, #tpu.memory_space<vmem>>, vector<1x32xf32>
    %c0_56 = arith.constant 0 : index
    %c0_57 = arith.constant 0 : index
    %124 = vector.load %arg11[%c0_56, %c0_57] : memref<1x32xf32, #tpu.memory_space<vmem>>, vector<1x32xf32>
    %cst_58 = arith.constant dense<0.000000e+00> : vector<8xf32>
    %125 = vector.multi_reduction <add>, %122, %cst_58 [1] : vector<8x32xf32> to vector<8xf32>
    %126 = vector.shape_cast %125 : vector<8xf32> to vector<8x1xf32>
    %cst_59 = arith.constant 3.200000e+01 : f32
    %127 = vector.broadcast %cst_59 : f32 to vector<8x1xf32>
    %128 = arith.divf %126, %127 : vector<8x1xf32>
    %129 = vector.broadcast %128 : vector<8x1xf32> to vector<8x32xf32>
    %130 = arith.subf %122, %129 : vector<8x32xf32>
    %131 = arith.mulf %130, %130 : vector<8x32xf32>
    %cst_60 = arith.constant dense<0.000000e+00> : vector<8xf32>
    %132 = vector.multi_reduction <add>, %131, %cst_60 [1] : vector<8x32xf32> to vector<8xf32>
    %133 = vector.shape_cast %132 : vector<8xf32> to vector<8x1xf32>
    %cst_61 = arith.constant 3.200000e+01 : f32
    %134 = vector.broadcast %cst_61 : f32 to vector<8x1xf32>
    %135 = arith.divf %133, %134 : vector<8x1xf32>
    %136 = vector.broadcast %128 : vector<8x1xf32> to vector<8x32xf32>
    %137 = arith.subf %122, %136 : vector<8x32xf32>
    %cst_62 = arith.constant 1.000000e-07 : f32
    %138 = vector.broadcast %cst_62 : f32 to vector<8x1xf32>
    %139 = arith.addf %135, %138 : vector<8x1xf32>
    %140 = math.rsqrt %139 : vector<8x1xf32>
    %141 = vector.broadcast %140 : vector<8x1xf32> to vector<8x32xf32>
    %142 = arith.mulf %137, %141 : vector<8x32xf32>
    %143 = vector.broadcast %123 : vector<1x32xf32> to vector<8x32xf32>
    %144 = arith.mulf %142, %143 : vector<8x32xf32>
    %145 = vector.broadcast %124 : vector<1x32xf32> to vector<8x32xf32>
    %146 = arith.addf %144, %145 : vector<8x32xf32>
    %147 = arith.addf %146, %5 : vector<8x32xf32>
    %148 = arith.truncf %147 : vector<8x32xf32> to vector<8x32xbf16>
    %c0_63 = arith.constant 0 : index
    %c0_64 = arith.constant 0 : index
    %149 = vector.load %arg12[%c0_63, %c0_64] : memref<32x32xbf16, #tpu.memory_space<vmem>>, vector<32x32xbf16>
    %cst_65 = arith.constant dense<0.000000e+00> : vector<8x32xf32>
    %150 = tpu.matmul %148, %149, %cst_65 {dimension_numbers = #tpu.dot_dimension_numbers<[1], [0], [0], [1], [0, 0, 1, 1], [], []>} : vector<8x32xbf16>, vector<32x32xbf16>, vector<8x32xf32> -> vector<8x32xf32>
    %151 = arith.addf %3, %7 : vector<8x32xf32>
    %152 = arith.truncf %151 : vector<8x32xf32> to vector<8x32xbf16>
    %c0_66 = arith.constant 0 : index
    %c0_67 = arith.constant 0 : index
    %153 = vector.load %arg13[%c0_66, %c0_67] : memref<32x32xbf16, #tpu.memory_space<vmem>>, vector<32x32xbf16>
    %cst_68 = arith.constant dense<0.000000e+00> : vector<8x32xf32>
    %154 = tpu.matmul %152, %153, %cst_68 {dimension_numbers = #tpu.dot_dimension_numbers<[1], [0], [0], [1], [0, 0, 1, 1], [], []>} : vector<8x32xbf16>, vector<32x32xbf16>, vector<8x32xf32> -> vector<8x32xf32>
    %155 = arith.truncf %3 : vector<8x32xf32> to vector<8x32xbf16>
    %c0_69 = arith.constant 0 : index
    %c0_70 = arith.constant 0 : index
    %156 = vector.load %arg14[%c0_69, %c0_70] : memref<32x32xbf16, #tpu.memory_space<vmem>>, vector<32x32xbf16>
    %cst_71 = arith.constant dense<0.000000e+00> : vector<8x32xf32>
    %157 = tpu.matmul %155, %156, %cst_71 {dimension_numbers = #tpu.dot_dimension_numbers<[1], [0], [0], [1], [0, 0, 1, 1], [], []>} : vector<8x32xbf16>, vector<32x32xbf16>, vector<8x32xf32> -> vector<8x32xf32>
    %158 = arith.truncf %150 : vector<8x32xf32> to vector<8x32xbf16>
    %159 = arith.truncf %154 : vector<8x32xf32> to vector<8x32xbf16>
    %160 = arith.truncf %157 : vector<8x32xf32> to vector<8x32xbf16>
    %161 = vector.extract_strided_slice %158 {offsets = [0, 0], sizes = [8, 8], strides = [1, 1]} : vector<8x32xbf16> to vector<8x8xbf16>
    %162 = vector.extract_strided_slice %159 {offsets = [0, 0], sizes = [8, 8], strides = [1, 1]} : vector<8x32xbf16> to vector<8x8xbf16>
    %cst_72 = arith.constant dense<0.000000e+00> : vector<8x8xf32>
    %163 = tpu.matmul %161, %162, %cst_72 {dimension_numbers = #tpu.dot_dimension_numbers<[1], [1], [0], [0], [0, 0, 1, 0], [], []>} : vector<8x8xbf16>, vector<8x8xbf16>, vector<8x8xf32> -> vector<8x8xf32>
    %cst_73 = arith.constant dense<0xFF800000> : vector<8xf32>
    %164 = vector.multi_reduction <maximumf>, %163, %cst_73 [1] : vector<8x8xf32> to vector<8xf32>
    %165 = vector.shape_cast %164 : vector<8xf32> to vector<8x1xf32>
    %166 = vector.broadcast %165 : vector<8x1xf32> to vector<8x8xf32>
    %167 = arith.subf %163, %166 : vector<8x8xf32>
    %168 = math.exp %167 : vector<8x8xf32>
    %cst_74 = arith.constant dense<0.000000e+00> : vector<8xf32>
    %169 = vector.multi_reduction <add>, %168, %cst_74 [1] : vector<8x8xf32> to vector<8xf32>
    %170 = vector.shape_cast %169 : vector<8xf32> to vector<8x1xf32>
    %171 = vector.broadcast %170 : vector<8x1xf32> to vector<8x8xf32>
    %172 = arith.divf %168, %171 : vector<8x8xf32>
    %173 = arith.truncf %172 : vector<8x8xf32> to vector<8x8xbf16>
    %174 = vector.extract_strided_slice %160 {offsets = [0, 0], sizes = [8, 8], strides = [1, 1]} : vector<8x32xbf16> to vector<8x8xbf16>
    %cst_75 = arith.constant dense<0.000000e+00> : vector<8x8xf32>
    %175 = tpu.matmul %173, %174, %cst_75 {dimension_numbers = #tpu.dot_dimension_numbers<[1], [0], [0], [1], [0, 0, 1, 1], [], []>} : vector<8x8xbf16>, vector<8x8xbf16>, vector<8x8xf32> -> vector<8x8xf32>
    %176 = arith.truncf %175 : vector<8x8xf32> to vector<8x8xbf16>
    %c0_76 = arith.constant 0 : index
    %c0_77 = arith.constant 0 : index
    %c0_78 = arith.constant 0 : index
    %177 = vector.load %arg15[%c0_76, %c0_77, %c0_78] : memref<4x8x32xbf16, #tpu.memory_space<vmem>>, vector<1x8x32xbf16>
    %178 = vector.shape_cast %177 : vector<1x8x32xbf16> to vector<8x32xbf16>
    %cst_79 = arith.constant dense<0.000000e+00> : vector<8x32xf32>
    %179 = tpu.matmul %176, %178, %cst_79 {dimension_numbers = #tpu.dot_dimension_numbers<[1], [0], [0], [1], [0, 0, 1, 1], [], []>} : vector<8x8xbf16>, vector<8x32xbf16>, vector<8x32xf32> -> vector<8x32xf32>
    %180 = vector.extract_strided_slice %158 {offsets = [0, 8], sizes = [8, 8], strides = [1, 1]} : vector<8x32xbf16> to vector<8x8xbf16>
    %181 = vector.extract_strided_slice %159 {offsets = [0, 8], sizes = [8, 8], strides = [1, 1]} : vector<8x32xbf16> to vector<8x8xbf16>
    %cst_80 = arith.constant dense<0.000000e+00> : vector<8x8xf32>
    %182 = tpu.matmul %180, %181, %cst_80 {dimension_numbers = #tpu.dot_dimension_numbers<[1], [1], [0], [0], [0, 0, 1, 0], [], []>} : vector<8x8xbf16>, vector<8x8xbf16>, vector<8x8xf32> -> vector<8x8xf32>
    %cst_81 = arith.constant dense<0xFF800000> : vector<8xf32>
    %183 = vector.multi_reduction <maximumf>, %182, %cst_81 [1] : vector<8x8xf32> to vector<8xf32>
    %184 = vector.shape_cast %183 : vector<8xf32> to vector<8x1xf32>
    %185 = vector.broadcast %184 : vector<8x1xf32> to vector<8x8xf32>
    %186 = arith.subf %182, %185 : vector<8x8xf32>
    %187 = math.exp %186 : vector<8x8xf32>
    %cst_82 = arith.constant dense<0.000000e+00> : vector<8xf32>
    %188 = vector.multi_reduction <add>, %187, %cst_82 [1] : vector<8x8xf32> to vector<8xf32>
    %189 = vector.shape_cast %188 : vector<8xf32> to vector<8x1xf32>
    %190 = vector.broadcast %189 : vector<8x1xf32> to vector<8x8xf32>
    %191 = arith.divf %187, %190 : vector<8x8xf32>
    %192 = arith.truncf %191 : vector<8x8xf32> to vector<8x8xbf16>
    %193 = vector.extract_strided_slice %160 {offsets = [0, 8], sizes = [8, 8], strides = [1, 1]} : vector<8x32xbf16> to vector<8x8xbf16>
    %cst_83 = arith.constant dense<0.000000e+00> : vector<8x8xf32>
    %194 = tpu.matmul %192, %193, %cst_83 {dimension_numbers = #tpu.dot_dimension_numbers<[1], [0], [0], [1], [0, 0, 1, 1], [], []>} : vector<8x8xbf16>, vector<8x8xbf16>, vector<8x8xf32> -> vector<8x8xf32>
    %195 = arith.truncf %194 : vector<8x8xf32> to vector<8x8xbf16>
    %c1_84 = arith.constant 1 : index
    %c0_85 = arith.constant 0 : index
    %c0_86 = arith.constant 0 : index
    %196 = vector.load %arg15[%c1_84, %c0_85, %c0_86] : memref<4x8x32xbf16, #tpu.memory_space<vmem>>, vector<1x8x32xbf16>
    %197 = vector.shape_cast %196 : vector<1x8x32xbf16> to vector<8x32xbf16>
    %cst_87 = arith.constant dense<0.000000e+00> : vector<8x32xf32>
    %198 = tpu.matmul %195, %197, %cst_87 {dimension_numbers = #tpu.dot_dimension_numbers<[1], [0], [0], [1], [0, 0, 1, 1], [], []>} : vector<8x8xbf16>, vector<8x32xbf16>, vector<8x32xf32> -> vector<8x32xf32>
    %199 = arith.addf %179, %198 : vector<8x32xf32>
    %200 = vector.extract_strided_slice %158 {offsets = [0, 16], sizes = [8, 8], strides = [1, 1]} : vector<8x32xbf16> to vector<8x8xbf16>
    %201 = vector.extract_strided_slice %159 {offsets = [0, 16], sizes = [8, 8], strides = [1, 1]} : vector<8x32xbf16> to vector<8x8xbf16>
    %cst_88 = arith.constant dense<0.000000e+00> : vector<8x8xf32>
    %202 = tpu.matmul %200, %201, %cst_88 {dimension_numbers = #tpu.dot_dimension_numbers<[1], [1], [0], [0], [0, 0, 1, 0], [], []>} : vector<8x8xbf16>, vector<8x8xbf16>, vector<8x8xf32> -> vector<8x8xf32>
    %cst_89 = arith.constant dense<0xFF800000> : vector<8xf32>
    %203 = vector.multi_reduction <maximumf>, %202, %cst_89 [1] : vector<8x8xf32> to vector<8xf32>
    %204 = vector.shape_cast %203 : vector<8xf32> to vector<8x1xf32>
    %205 = vector.broadcast %204 : vector<8x1xf32> to vector<8x8xf32>
    %206 = arith.subf %202, %205 : vector<8x8xf32>
    %207 = math.exp %206 : vector<8x8xf32>
    %cst_90 = arith.constant dense<0.000000e+00> : vector<8xf32>
    %208 = vector.multi_reduction <add>, %207, %cst_90 [1] : vector<8x8xf32> to vector<8xf32>
    %209 = vector.shape_cast %208 : vector<8xf32> to vector<8x1xf32>
    %210 = vector.broadcast %209 : vector<8x1xf32> to vector<8x8xf32>
    %211 = arith.divf %207, %210 : vector<8x8xf32>
    %212 = arith.truncf %211 : vector<8x8xf32> to vector<8x8xbf16>
    %213 = vector.extract_strided_slice %160 {offsets = [0, 16], sizes = [8, 8], strides = [1, 1]} : vector<8x32xbf16> to vector<8x8xbf16>
    %cst_91 = arith.constant dense<0.000000e+00> : vector<8x8xf32>
    %214 = tpu.matmul %212, %213, %cst_91 {dimension_numbers = #tpu.dot_dimension_numbers<[1], [0], [0], [1], [0, 0, 1, 1], [], []>} : vector<8x8xbf16>, vector<8x8xbf16>, vector<8x8xf32> -> vector<8x8xf32>
    %215 = arith.truncf %214 : vector<8x8xf32> to vector<8x8xbf16>
    %c2_92 = arith.constant 2 : index
    %c0_93 = arith.constant 0 : index
    %c0_94 = arith.constant 0 : index
    %216 = vector.load %arg15[%c2_92, %c0_93, %c0_94] : memref<4x8x32xbf16, #tpu.memory_space<vmem>>, vector<1x8x32xbf16>
    %217 = vector.shape_cast %216 : vector<1x8x32xbf16> to vector<8x32xbf16>
    %cst_95 = arith.constant dense<0.000000e+00> : vector<8x32xf32>
    %218 = tpu.matmul %215, %217, %cst_95 {dimension_numbers = #tpu.dot_dimension_numbers<[1], [0], [0], [1], [0, 0, 1, 1], [], []>} : vector<8x8xbf16>, vector<8x32xbf16>, vector<8x32xf32> -> vector<8x32xf32>
    %219 = arith.addf %199, %218 : vector<8x32xf32>
    %220 = vector.extract_strided_slice %158 {offsets = [0, 24], sizes = [8, 8], strides = [1, 1]} : vector<8x32xbf16> to vector<8x8xbf16>
    %221 = vector.extract_strided_slice %159 {offsets = [0, 24], sizes = [8, 8], strides = [1, 1]} : vector<8x32xbf16> to vector<8x8xbf16>
    %cst_96 = arith.constant dense<0.000000e+00> : vector<8x8xf32>
    %222 = tpu.matmul %220, %221, %cst_96 {dimension_numbers = #tpu.dot_dimension_numbers<[1], [1], [0], [0], [0, 0, 1, 0], [], []>} : vector<8x8xbf16>, vector<8x8xbf16>, vector<8x8xf32> -> vector<8x8xf32>
    %cst_97 = arith.constant dense<0xFF800000> : vector<8xf32>
    %223 = vector.multi_reduction <maximumf>, %222, %cst_97 [1] : vector<8x8xf32> to vector<8xf32>
    %224 = vector.shape_cast %223 : vector<8xf32> to vector<8x1xf32>
    %225 = vector.broadcast %224 : vector<8x1xf32> to vector<8x8xf32>
    %226 = arith.subf %222, %225 : vector<8x8xf32>
    %227 = math.exp %226 : vector<8x8xf32>
    %cst_98 = arith.constant dense<0.000000e+00> : vector<8xf32>
    %228 = vector.multi_reduction <add>, %227, %cst_98 [1] : vector<8x8xf32> to vector<8xf32>
    %229 = vector.shape_cast %228 : vector<8xf32> to vector<8x1xf32>
    %230 = vector.broadcast %229 : vector<8x1xf32> to vector<8x8xf32>
    %231 = arith.divf %227, %230 : vector<8x8xf32>
    %232 = arith.truncf %231 : vector<8x8xf32> to vector<8x8xbf16>
    %233 = vector.extract_strided_slice %160 {offsets = [0, 24], sizes = [8, 8], strides = [1, 1]} : vector<8x32xbf16> to vector<8x8xbf16>
    %cst_99 = arith.constant dense<0.000000e+00> : vector<8x8xf32>
    %234 = tpu.matmul %232, %233, %cst_99 {dimension_numbers = #tpu.dot_dimension_numbers<[1], [0], [0], [1], [0, 0, 1, 1], [], []>} : vector<8x8xbf16>, vector<8x8xbf16>, vector<8x8xf32> -> vector<8x8xf32>
    %235 = arith.truncf %234 : vector<8x8xf32> to vector<8x8xbf16>
    %c3_100 = arith.constant 3 : index
    %c0_101 = arith.constant 0 : index
    %c0_102 = arith.constant 0 : index
    %236 = vector.load %arg15[%c3_100, %c0_101, %c0_102] : memref<4x8x32xbf16, #tpu.memory_space<vmem>>, vector<1x8x32xbf16>
    %237 = vector.shape_cast %236 : vector<1x8x32xbf16> to vector<8x32xbf16>
    %cst_103 = arith.constant dense<0.000000e+00> : vector<8x32xf32>
    %238 = tpu.matmul %235, %237, %cst_103 {dimension_numbers = #tpu.dot_dimension_numbers<[1], [0], [0], [1], [0, 0, 1, 1], [], []>} : vector<8x8xbf16>, vector<8x32xbf16>, vector<8x32xf32> -> vector<8x32xf32>
    %239 = arith.addf %219, %238 : vector<8x32xf32>
    %240 = arith.addf %122, %239 : vector<8x32xf32>
    %c0_104 = arith.constant 0 : index
    %c0_105 = arith.constant 0 : index
    %241 = vector.load %arg16[%c0_104, %c0_105] : memref<1x32xf32, #tpu.memory_space<vmem>>, vector<1x32xf32>
    %c0_106 = arith.constant 0 : index
    %c0_107 = arith.constant 0 : index
    %242 = vector.load %arg17[%c0_106, %c0_107] : memref<1x32xf32, #tpu.memory_space<vmem>>, vector<1x32xf32>
    %cst_108 = arith.constant dense<0.000000e+00> : vector<8xf32>
    %243 = vector.multi_reduction <add>, %240, %cst_108 [1] : vector<8x32xf32> to vector<8xf32>
    %244 = vector.shape_cast %243 : vector<8xf32> to vector<8x1xf32>
    %cst_109 = arith.constant 3.200000e+01 : f32
    %245 = vector.broadcast %cst_109 : f32 to vector<8x1xf32>
    %246 = arith.divf %244, %245 : vector<8x1xf32>
    %247 = vector.broadcast %246 : vector<8x1xf32> to vector<8x32xf32>
    %248 = arith.subf %240, %247 : vector<8x32xf32>
    %249 = arith.mulf %248, %248 : vector<8x32xf32>
    %cst_110 = arith.constant dense<0.000000e+00> : vector<8xf32>
    %250 = vector.multi_reduction <add>, %249, %cst_110 [1] : vector<8x32xf32> to vector<8xf32>
    %251 = vector.shape_cast %250 : vector<8xf32> to vector<8x1xf32>
    %cst_111 = arith.constant 3.200000e+01 : f32
    %252 = vector.broadcast %cst_111 : f32 to vector<8x1xf32>
    %253 = arith.divf %251, %252 : vector<8x1xf32>
    %254 = vector.broadcast %246 : vector<8x1xf32> to vector<8x32xf32>
    %255 = arith.subf %240, %254 : vector<8x32xf32>
    %cst_112 = arith.constant 1.000000e-07 : f32
    %256 = vector.broadcast %cst_112 : f32 to vector<8x1xf32>
    %257 = arith.addf %253, %256 : vector<8x1xf32>
    %258 = math.rsqrt %257 : vector<8x1xf32>
    %259 = vector.broadcast %258 : vector<8x1xf32> to vector<8x32xf32>
    %260 = arith.mulf %255, %259 : vector<8x32xf32>
    %261 = vector.broadcast %241 : vector<1x32xf32> to vector<8x32xf32>
    %262 = arith.mulf %260, %261 : vector<8x32xf32>
    %263 = vector.broadcast %242 : vector<1x32xf32> to vector<8x32xf32>
    %264 = arith.addf %262, %263 : vector<8x32xf32>
    %265 = arith.truncf %264 : vector<8x32xf32> to vector<8x32xbf16>
    %c0_113 = arith.constant 0 : index
    %c0_114 = arith.constant 0 : index
    %266 = vector.load %arg18[%c0_113, %c0_114] : memref<32x64xbf16, #tpu.memory_space<vmem>>, vector<32x64xbf16>
    %cst_115 = arith.constant dense<0.000000e+00> : vector<8x64xf32>
    %267 = tpu.matmul %265, %266, %cst_115 {dimension_numbers = #tpu.dot_dimension_numbers<[1], [0], [0], [1], [0, 0, 1, 1], [], []>} : vector<8x32xbf16>, vector<32x64xbf16>, vector<8x64xf32> -> vector<8x64xf32>
    %c0_116 = arith.constant 0 : index
    %c0_117 = arith.constant 0 : index
    %268 = vector.load %arg19[%c0_116, %c0_117] : memref<1x64xf32, #tpu.memory_space<vmem>>, vector<1x64xf32>
    %269 = vector.broadcast %268 : vector<1x64xf32> to vector<8x64xf32>
    %270 = arith.addf %267, %269 : vector<8x64xf32>
    %cst_118 = arith.constant 0.000000e+00 : f32
    %271 = vector.broadcast %cst_118 : f32 to vector<8x64xf32>
    %272 = arith.maximumf %270, %271 : vector<8x64xf32>
    %273 = arith.truncf %272 : vector<8x64xf32> to vector<8x64xbf16>
    %c0_119 = arith.constant 0 : index
    %c0_120 = arith.constant 0 : index
    %274 = vector.load %arg20[%c0_119, %c0_120] : memref<64x32xbf16, #tpu.memory_space<vmem>>, vector<64x32xbf16>
    %cst_121 = arith.constant dense<0.000000e+00> : vector<8x32xf32>
    %275 = tpu.matmul %273, %274, %cst_121 {dimension_numbers = #tpu.dot_dimension_numbers<[1], [0], [0], [1], [0, 0, 1, 1], [], []>} : vector<8x64xbf16>, vector<64x32xbf16>, vector<8x32xf32> -> vector<8x32xf32>
    %c0_122 = arith.constant 0 : index
    %c0_123 = arith.constant 0 : index
    %276 = vector.load %arg21[%c0_122, %c0_123] : memref<1x32xf32, #tpu.memory_space<vmem>>, vector<1x32xf32>
    %277 = vector.broadcast %276 : vector<1x32xf32> to vector<8x32xf32>
    %278 = arith.addf %275, %277 : vector<8x32xf32>
    %279 = arith.addf %240, %278 : vector<8x32xf32>
    %c0_124 = arith.constant 0 : index
    %c0_125 = arith.constant 0 : index
    %c0_126 = arith.constant 0 : index
    %280 = vector.load %arg22[%c0_124, %c0_125, %c0_126] : memref<1x8x32xf32, #tpu.memory_space<vmem>>, vector<1x8x32xf32>
    %281 = vector.shape_cast %280 : vector<1x8x32xf32> to vector<8x32xf32>
    %282 = vector.shape_cast %279 : vector<8x32xf32> to vector<1x8x32xf32>
    tpu.vector_store %arg22[%c0_124, %c0_125, %c0_126], %282 {strides = array<i32>} : memref<1x8x32xf32, #tpu.memory_space<vmem>>, vector<1x8x32xf32>,
    return
  }
  func.func @transform_0(%arg0: i32) -> (i32, i32, i32) {
    %c0_i32 = arith.constant 0 : i32
    %c0_i32_0 = arith.constant 0 : i32
    %c0_i32_1 = arith.constant 0 : i32
    return %arg0, %c0_i32, %c0_i32_0 : i32, i32, i32
  }
  func.func @transform_1(%arg0: i32) -> (i32, i32, i32) {
    %c0_i32 = arith.constant 0 : i32
    %c0_i32_0 = arith.constant 0 : i32
    %c0_i32_1 = arith.constant 0 : i32
    return %arg0, %c0_i32, %c0_i32_0 : i32, i32, i32
  }
  func.func @transform_2(%arg0: i32) -> (i32, i32, i32) {
    %c0_i32 = arith.constant 0 : i32
    %c0_i32_0 = arith.constant 0 : i32
    %c0_i32_1 = arith.constant 0 : i32
    return %arg0, %c0_i32, %c0_i32_0 : i32, i32, i32
  }
  func.func @transform_3(%arg0: i32) -> (i32, i32, i32) {
    %c0_i32 = arith.constant 0 : i32
    %c0_i32_0 = arith.constant 0 : i32
    %c0_i32_1 = arith.constant 0 : i32
    return %arg0, %c0_i32, %c0_i32_0 : i32, i32, i32
  }
  func.func @transform_4(%arg0: i32) -> (i32, i32) {
    %c0_i32 = arith.constant 0 : i32
    %c0_i32_0 = arith.constant 0 : i32
    %c0_i32_1 = arith.constant 0 : i32
    return %c0_i32, %c0_i32_0 : i32, i32
  }
  func.func @transform_5(%arg0: i32) -> (i32, i32) {
    %c0_i32 = arith.constant 0 : i32
    %c0_i32_0 = arith.constant 0 : i32
    %c0_i32_1 = arith.constant 0 : i32
    return %c0_i32, %c0_i32_0 : i32, i32
  }
  func.func @transform_6(%arg0: i32) -> (i32, i32) {
    %c0_i32 = arith.constant 0 : i32
    %c0_i32_0 = arith.constant 0 : i32
    %c0_i32_1 = arith.constant 0 : i32
    return %c0_i32, %c0_i32_0 : i32, i32
  }
  func.func @transform_7(%arg0: i32) -> (i32, i32) {
    %c0_i32 = arith.constant 0 : i32
    %c0_i32_0 = arith.constant 0 : i32
    %c0_i32_1 = arith.constant 0 : i32
    return %c0_i32, %c0_i32_0 : i32, i32
  }
  func.func @transform_8(%arg0: i32) -> (i32, i32, i32) {
    %c0_i32 = arith.constant 0 : i32
    %c0_i32_0 = arith.constant 0 : i32
    %c0_i32_1 = arith.constant 0 : i32
    %c0_i32_2 = arith.constant 0 : i32
    return %c0_i32, %c0_i32_0, %c0_i32_1 : i32, i32, i32
  }
  func.func @transform_9(%arg0: i32) -> (i32, i32) {
    %c0_i32 = arith.constant 0 : i32
    %c0_i32_0 = arith.constant 0 : i32
    %c0_i32_1 = arith.constant 0 : i32
    return %c0_i32, %c0_i32_0 : i32, i32
  }
  func.func @transform_10(%arg0: i32) -> (i32, i32) {
    %c0_i32 = arith.constant 0 : i32
    %c0_i32_0 = arith.constant 0 : i32
    %c0_i32_1 = arith.constant 0 : i32
    return %c0_i32, %c0_i32_0 : i32, i32
  }
  func.func @transform_11(%arg0: i32) -> (i32, i32) {
    %c0_i32 = arith.constant 0 : i32
    %c0_i32_0 = arith.constant 0 : i32
    %c0_i32_1 = arith.constant 0 : i32
    return %c0_i32, %c0_i32_0 : i32, i32
  }
  func.func @transform_12(%arg0: i32) -> (i32, i32) {
    %c0_i32 = arith.constant 0 : i32
    %c0_i32_0 = arith.constant 0 : i32
    %c0_i32_1 = arith.constant 0 : i32
    return %c0_i32, %c0_i32_0 : i32, i32
  }
  func.func @transform_13(%arg0: i32) -> (i32, i32) {
    %c0_i32 = arith.constant 0 : i32
    %c0_i32_0 = arith.constant 0 : i32
    %c0_i32_1 = arith.constant 0 : i32
    return %c0_i32, %c0_i32_0 : i32, i32
  }
  func.func @transform_14(%arg0: i32) -> (i32, i32, i32) {
    %c0_i32 = arith.constant 0 : i32
    %c0_i32_0 = arith.constant 0 : i32
    %c0_i32_1 = arith.constant 0 : i32
    %c0_i32_2 = arith.constant 0 : i32
    return %c0_i32, %c0_i32_0, %c0_i32_1 : i32, i32, i32
  }
  func.func @transform_15(%arg0: i32) -> (i32, i32) {
    %c0_i32 = arith.constant 0 : i32
    %c0_i32_0 = arith.constant 0 : i32
    %c0_i32_1 = arith.constant 0 : i32
    return %c0_i32, %c0_i32_0 : i32, i32
  }
  func.func @transform_16(%arg0: i32) -> (i32, i32) {
    %c0_i32 = arith.constant 0 : i32
    %c0_i32_0 = arith.constant 0 : i32
    %c0_i32_1 = arith.constant 0 : i32
    return %c0_i32, %c0_i32_0 : i32, i32
  }
  func.func @transform_17(%arg0: i32) -> (i32, i32) {
    %c0_i32 = arith.constant 0 : i32
    %c0_i32_0 = arith.constant 0 : i32
    %c0_i32_1 = arith.constant 0 : i32
    return %c0_i32, %c0_i32_0 : i32, i32
  }
  func.func @transform_18(%arg0: i32) -> (i32, i32) {
    %c0_i32 = arith.constant 0 : i32
    %c0_i32_0 = arith.constant 0 : i32
    %c0_i32_1 = arith.constant 0 : i32
    return %c0_i32, %c0_i32_0 : i32, i32
  }
  func.func @transform_19(%arg0: i32) -> (i32, i32) {
    %c0_i32 = arith.constant 0 : i32
    %c0_i32_0 = arith.constant 0 : i32
    %c0_i32_1 = arith.constant 0 : i32
    return %c0_i32, %c0_i32_0 : i32, i32
  }
  func.func @transform_20(%arg0: i32) -> (i32, i32) {
    %c0_i32 = arith.constant 0 : i32
    %c0_i32_0 = arith.constant 0 : i32
    %c0_i32_1 = arith.constant 0 : i32
    return %c0_i32, %c0_i32_0 : i32, i32
  }
  func.func @transform_21(%arg0: i32) -> (i32, i32, i32) {
    %c0_i32 = arith.constant 0 : i32
    %c0_i32_0 = arith.constant 0 : i32
    %c0_i32_1 = arith.constant 0 : i32
    return %arg0, %c0_i32, %c0_i32_0 : i32, i32, i32
  }
}

</mosaic_0001>

<bundles_post_ra>
// kernel: tpu_custom_call.1
= control target key start
LH: loop header
LB: loop body
LE: loop exit
PB: predicated region body
PF: predicated region fallthrough
CT: control target
= control target key end

     0   :  { %s4863_s0 = inlined_call_operand.vmem [shape: f32[2,8,32], index: 0, kind: input, shape index: {}]   ;;  %s4864_s1 = inlined_call_operand.vmem [shape: f32[2,8,32], index: 1, kind: input, shape index: {}]   ;;  %s4865_s2 = inlined_call_operand.vmem [shape: f32[2,8,32], index: 2, kind: input, shape index: {}]   ;;  %s4866_s3 = inlined_call_operand.hbm [shape: f32[2,8,32], index: 3, kind: input, shape index: {}]   ;;  %s4867_s4 = inlined_call_operand.hbm [shape: f32[1,32], index: 4, kind: input, shape index: {}]   ;;  %s4868_s5 = inlined_call_operand.hbm [shape: f32[1,32], index: 5, kind: input, shape index: {}]   ;;  %s4869_s6 = inlined_call_operand.hbm [shape: bf16[32,64], index: 6, kind: input, shape index: {}]   ;;  %s4870_s7 = inlined_call_operand.hbm [shape: bf16[32,32], index: 7, kind: input, shape index: {}]   ;;  %s4871_s8 = inlined_call_operand.hbm [shape: bf16[4,8,32], index: 8, kind: input, shape index: {}]   ;;  %s4872_s9 = inlined_call_operand.hbm [shape: f32[1,32], index: 9, kind: input, shape index: {}]   ;;  %s4873_s10 = inlined_call_operand.hbm [shape: f32[1,32], index: 10, kind: input, shape index: {}]   ;;  %s4874_s11 = inlined_call_operand.vmem [shape: bf16[32,32], index: 11, kind: input, shape index: {}]   ;;  %s4875_s12 = inlined_call_operand.hbm [shape: bf16[32,32], index: 12, kind: input, shape index: {}]   ;;  %s4876_s13 = inlined_call_operand.hbm [shape: bf16[32,32], index: 13, kind: input, shape index: {}]   ;;  %s4877_s14 = inlined_call_operand.hbm [shape: bf16[4,8,32], index: 14, kind: input, shape index: {}]   ;;  %s4878_s15 = inlined_call_operand.hbm [shape: f32[1,32], index: 15, kind: input, shape index: {}]   ;;  %s4879_s16 = inlined_call_operand.hbm [shape: f32[1,32], index: 16, kind: input, shape index: {}]   ;;  %s4880_s17 = inlined_call_operand.hbm [shape: bf16[32,64], index: 17, kind: input, shape index: {}]   ;;  %s4881_s18 = inlined_call_operand.hbm [shape: f32[1,64], index: 18, kind: input, shape index: {}]   ;;  %s4882_s19 = inlined_call_operand.vmem [shape: bf16[64,32], index: 19, kind: input, shape index: {}]   ;;  %s4883_s20 = inlined_call_operand.vmem [shape: f32[1,32], index: 20, kind: input, shape index: {}]   ;;  %s4884_s21 = inlined_call_operand.hbm [shape: f32[2,8,32], index: 21, kind: output, shape index: {}]  }
   0x1   :  { %4892 = sst [smem:[#allocation36_spill]] %s4863_s0 }
   0x2   :  { %4893 = sst [smem:[#allocation37_spill]] %s4864_s1 }
   0x3   :  { %4894 = sst [smem:[#allocation38_spill]] %s4865_s2 }
   0x4   :  { %4895 = sst [smem:[#allocation39_spill]] %s4866_s3 }
   0x5   :  { %4896 = sst [smem:[#allocation40_spill]] %s4867_s4 }
   0x6   :  { %4897 = sst [smem:[#allocation41_spill]] %s4868_s5 }
   0x7   :  { %4898 = sst [smem:[#allocation42_spill]] %s4869_s6 }
   0x8   :  { %4899 = sst [smem:[#allocation43_spill]] %s4870_s7 }
   0x9   :  { %4900 = sst [smem:[#allocation44_spill]] %s4871_s8 }
   0xa   :  { %4901 = sst [smem:[#allocation45_spill]] %s4872_s9 }
   0xb   :  { %4902 = sst [smem:[#allocation46_spill]] %s4873_s10 }
   0xc   :  { %4903 = sst [smem:[#allocation47_spill]] %s4875_s12 }
   0xd   :  { %4904 = sst [smem:[#allocation48_spill]] %s4876_s13 }
   0xe   :  { %4905 = sst [smem:[#allocation49_spill]] %s4877_s14 }
   0xf   :  { %4906 = sst [smem:[#allocation50_spill]] %s4882_s19 }
  0x10   :  { %4907 = sst [smem:[#allocation51_spill]] %s4883_s20 }
  0x11   :  { %4908 = sst [smem:[#allocation52_spill]] %s4884_s21 }
  0x12   :  { %26 = vsyncpa [#allocation3], 0 }
  0x13   :  { %28 = vsyncpa [#allocation3 + $0x1], 0 }
  0x14   :  { %29 = vsyncpa [#allocation6], 0 }
  0x15   :  { %30 = vsyncpa [#allocation9], 0 }
  0x16   :  { %31 = vsyncpa [#allocation12], 0 }
  0x17   :  { %32 = vsyncpa [#allocation15], 0 }
  0x18   :  { %33 = vsyncpa [#allocation18], 0 }
  0x19   :  { %34 = vsyncpa [#allocation21], 0 }
  0x1a   :  { %35 = vsyncpa [#allocation24], 0 }
  0x1b   :  { %36 = vsyncpa [#allocation4], 0 }
  0x1c   :  { %38 = vsyncpa [#allocation4 + $0x1], 0  ;;  %s4242_s2 = smov 0   ;;  %s4244_s25 = smov 0  }
  0x1d   :  { %s4246_s26 = smov 0   ;;  %s4248_s27 = smov 0  }
  0x1e LB: > { %s4105_s3 = smov [#allocation5]   ;;  %s4263_s29 = sadd.s32 4294967295, %s4103_s27   ;;  %s4103_s27 = sphi %s4248_s27, %s4957_s27   ;;  %s4099_s26 = sphi %s4246_s26, %s4956_s26   ;;  %s4095_s25 = sphi %s4244_s25, %s4955_s25   ;;  %s4091_s2 = sphi %s4242_s2, %s4954_s2  }
  0x1f   : > { %s549_s28 = sshll.u32 %s4105_s3, 4  ;;  %p2995_p0 = scmp.ge.s32.totalorder %s4103_s27, 1  ;;  %s550_s28 = int_to_ptr.vmem [resolvable:$true] %s549_s28 }
  0x20   : > { %p4888_p1 = scmp.eq.s32.totalorder %s4263_s29, 0  ;;  %p536_p2 = scmp.lt.s32.totalorder %s4103_s27, 3 }
  0x21   : > { %s4106_s4 = smov [#allocation8]   ;;  %s4107_s22 = smov [#allocation11]  }
  0x22   : > { %p4268_p3 = pnand %p2995_p0, %p536_p2  ;;  %s570_s30 = sshll.u32 %s4106_s4, 4  ;;  %s4275_s30 = int_to_ptr.vmem [resolvable:$true] %s570_s30 }
  0x23   : > { %s596_s23 = sshll.u32 %s4107_s22, 4  ;;  %s3630_s24 = scalar_lea.vmem %s550_s28, 16  ;;  %s4283_s23 = int_to_ptr.vmem [resolvable:$true] %s596_s23 }
  0x24   : > { %s4909_s0 = scalar_select %p4268_p3, 1, 0 }
  0x25   : > { %p3427_p5 = pneg %p4268_p3  ;;  %p3631_p8 = scmp.ne.s32.totalorder %s550_s28, %s3630_s24 }
  0x26   : > { %s3637_s3 = scalar_lea.vmem %s550_s28, 32  ;;  %p3638_p11 = scmp.lt.s32.totalorder %s550_s28, %s550_s28 }
  0x27   : > { %p4279_p6 = pnand %p3427_p5, %p4888_p1  ;;  %p3639_p12 = scmp.lt.s32.totalorder %s3637_s3, %s3630_s24 }
  0x29   : > { %p4287_p7 = pneg %p4279_p6  ;;  %p3640_p13 = por %p3639_p12, %p3638_p11 }
  0x2b   : > { %p3633_p9 = pnand %p3631_p8, %p4287_p7 }
  0x2d   : > { %p3634_p10 = pneg %p3633_p9 }
  0x2f   : > { %p3641_p0 = pnand %p3640_p13, %p3634_p10 }
  0x31   : > { %3644 = shalt.err (!%p3641_p0)
}
  0x32   : > { %s4912_s21 = sld [smem:[#allocation40_spill]]  ;;  %s3656_s20 = scalar_lea.vmem %s4275_s30, 256 }
  0x33   : > { %p3657_p2 = scmp.ne.s32.totalorder %s4275_s30, %s3656_s20  ;;  %p3664_p9 = scmp.lt.s32.totalorder %s4275_s30, %s4275_s30 }
  0x34   : > { %p3665_p11 = scmp.lt.s32.totalorder %s3656_s20, %s3656_s20 }
  0x35   : > { %p3659_p5 = pnand %p3657_p2, %p4287_p7 }
  0x36   : > { %p3666_p10 = por %p3665_p11, %p3664_p9 }
  0x37   : > { %p3660_p8 = pneg %p3659_p5 }
  0x38   : > { %3430 = dma.hbm_to_vmem [thread:$0]  (!%p4279_p6), %s4912_s21, 16, %s550_s28, [#allocation6]  }
  0x39   : > { %p3667_p12 = pnand %p3666_p10, %p3660_p8 }
  0x3b   : > { %3670 = shalt.err (!%p3667_p12)
}
  0x3c   : > { %s4108_s24 = smov 64   ;;  %s4109_s3 = smov 4  }
  0x3d   : > { %s4913_s6 = sld [smem:[#allocation42_spill]]  ;;  %s3682_s20 = scalar_lea.vmem %s4283_s23, 256 }
  0x3e   : > { %p3683_p13 = scmp.ne.s32.totalorder %s4283_s23, %s3682_s20  ;;  %p3690_p5 = scmp.lt.s32.totalorder %s4283_s23, %s4283_s23 }
  0x3f   : > { %p3691_p8 = scmp.lt.s32.totalorder %s3682_s20, %s3682_s20 }
  0x40   : > { %p3685_p0 = pnand %p3683_p13, %p4287_p7 }
  0x41   : > { %p3692_p9 = por %p3691_p8, %p3690_p5 }
  0x42   : > { %p3686_p2 = pneg %p3685_p0 }
  0x43   : > { %3436 = dma.hbm_to_vmem [thread:$0]  (!%p4279_p6), %s4913_s6, 256, %s4275_s30, [#allocation9], %s4108_s24, %s4108_s24, %s4109_s3  }
  0x44   : > { %p3693_p11 = pnand %p3692_p9, %p3686_p2 }
  0x46   : > { %3696 = shalt.err (!%p3693_p11)
}
  0x47   : > { %s4914_s8 = sld [smem:[#allocation44_spill]]  ;;  %s4110_s30 = smov [#allocation14]  }
  0x48   : > { %s621_s21 = sshll.u32 %s4110_s30, 4  ;;  %s4111_s28 = smov [#allocation17]   ;;  %s622_s21 = int_to_ptr.vmem [resolvable:$true] %s621_s21 }
  0x49   : > { %s647_s6 = sshll.u32 %s4111_s28, 4  ;;  %s3708_s20 = scalar_lea.vmem %s622_s21, 16  ;;  %s648_s6 = int_to_ptr.vmem [resolvable:$true] %s647_s6 }
  0x4a   : > { %p3709_p10 = scmp.ne.s32.totalorder %s622_s21, %s3708_s20  ;;  %s3715_s19 = scalar_lea.vmem %s622_s21, 32 }
  0x4b   : > { %p3716_p0 = scmp.lt.s32.totalorder %s622_s21, %s622_s21  ;;  %p3717_p2 = scmp.lt.s32.totalorder %s3715_s19, %s3708_s20 }
  0x4c   : > { %p3711_p12 = pnand %p3709_p10, %p4287_p7 }
  0x4d   : > { %3442 = dma.hbm_to_vmem [thread:$0]  (!%p4279_p6), %s4914_s8, 256, %s4283_s23, [#allocation12], %s4108_s24, %s4108_s24, %s4109_s3  }
  0x4e   : > { %p3712_p13 = pneg %p3711_p12  ;;  %p3718_p5 = por %p3717_p2, %p3716_p0 }
  0x50   : > { %p3719_p8 = pnand %p3718_p5, %p3712_p13 }
  0x52   : > { %3722 = shalt.err (!%p3719_p8)
}
  0x53   : > { %s4915_s10 = sld [smem:[#allocation46_spill]]  ;;  %s3734_s22 = scalar_lea.vmem %s648_s6, 256 }
  0x54   : > { %p3735_p9 = scmp.ne.s32.totalorder %s648_s6, %s3734_s22  ;;  %p3742_p12 = scmp.lt.s32.totalorder %s648_s6, %s648_s6 }
  0x55   : > { %p3743_p4 = scmp.lt.s32.totalorder %s3734_s22, %s3734_s22 }
  0x56   : > { %p3737_p11 = pnand %p3735_p9, %p4287_p7 }
  0x57   : > { %p3744_p1 = por %p3743_p4, %p3742_p12 }
  0x58   : > { %p3738_p10 = pneg %p3737_p11 }
  0x59   : > { %3448 = dma.hbm_to_vmem [thread:$0]  (!%p4279_p6), %s4915_s10, 16, %s622_s21, [#allocation15]  }
  0x5a   : > { %p3745_p3 = pnand %p3744_p1, %p3738_p10 }
  0x5c   : > { %3748 = shalt.err (!%p3745_p3)
}
  0x5d   : > { %s4916_s13 = sld [smem:[#allocation48_spill]]  ;;  %s4112_s21 = smov [#allocation20]  }
  0x5e   : > { %s674_s28 = sshll.u32 %s4112_s21, 4  ;;  %s4113_s20 = smov [#allocation23]   ;;  %s675_s28 = int_to_ptr.vmem [resolvable:$true] %s674_s28 }
  0x5f   : > { %s695_s4 = sshll.u32 %s4113_s20, 4  ;;  %s3760_s23 = scalar_lea.vmem %s675_s28, 16  ;;  %s696_s4 = int_to_ptr.vmem [resolvable:$true] %s695_s4 }
  0x60   : > { %p3761_p13 = scmp.ne.s32.totalorder %s675_s28, %s3760_s23  ;;  %s3767_s22 = scalar_lea.vmem %s675_s28, 32 }
  0x61   : > { %p3768_p4 = scmp.lt.s32.totalorder %s675_s28, %s675_s28  ;;  %p3769_p0 = scmp.lt.s32.totalorder %s3767_s22, %s3760_s23 }
  0x62   : > { %p3763_p1 = pnand %p3761_p13, %p4287_p7 }
  0x63   : > { %3454 = dma.hbm_to_vmem [thread:$0]  (!%p4279_p6), %s4916_s13, 256, %s648_s6, [#allocation18], %s4108_s24, %s4108_s24, %s4109_s3  }
  0x64   : > { %p3764_p3 = pneg %p3763_p1  ;;  %p3770_p2 = por %p3769_p0, %p3768_p4 }
  0x66   : > { %p3771_p5 = pnand %p3770_p2, %p3764_p3 }
  0x68   : > { %3774 = shalt.err (!%p3771_p5)
}
  0x69   : > { %3460 = dma.hbm_to_vmem [thread:$0]  (!%p4279_p6), %s4878_s15, 16, %s675_s28, [#allocation21]  }
  0x6a   : > { %s3786_s30 = scalar_lea.vmem %s696_s4, 256  ;;  %p3794_p10 = scmp.lt.s32.totalorder %s696_s4, %s696_s4 }
  0x6b   : > { %p3787_p8 = scmp.ne.s32.totalorder %s696_s4, %s3786_s30  ;;  %p3795_p12 = scmp.lt.s32.totalorder %s3786_s30, %s3786_s30 }
  0x6d   : > { %p3789_p9 = pnand %p3787_p8, %p4287_p7  ;;  %p3796_p13 = por %p3795_p12, %p3794_p10 }
  0x6f   : > { %p3790_p11 = pneg %p3789_p9 }
  0x71   : > { %p3797_p1 = pnand %p3796_p13, %p3790_p11 }
  0x73   : > { %3800 = shalt.err (!%p3797_p1)
}
  0x74   : > { %3466 = dma.hbm_to_vmem [thread:$0]  (!%p4279_p6), %s4880_s17, 256, %s696_s4, [#allocation24], %s4108_s24, %s4108_s24, %s4109_s3  }
  0x75   : > { %s4114_s28 = smov [#allocation7]   ;;  %s4115_s22 = smov [#allocation10]  }
  0x76   : > { %s560_s23 = sshll.u32 %s4114_s28, 4  ;;  %s583_s19 = sshll.u32 %s4115_s22, 4  ;;  %s561_s23 = int_to_ptr.vmem [resolvable:$true] %s560_s23  ;;  %s584_s19 = int_to_ptr.vmem [resolvable:$true] %s583_s19 }
  0x77   : > { %s3812_s6 = scalar_lea.vmem %s561_s23, 16  ;;  %s3819_s30 = scalar_lea.vmem %s561_s23, 32 }
  0x78   : > { %p3813_p3 = scmp.ne.s32.totalorder %s561_s23, %s3812_s6  ;;  %p3820_p2 = scmp.lt.s32.totalorder %s561_s23, %s561_s23 }
  0x79   : > { %p3821_p5 = scmp.lt.s32.totalorder %s3819_s30, %s3812_s6 }
  0x7a   : > { %p3815_p4 = pnand %p3813_p3, %p4287_p7 }
  0x7b   : > { %p3822_p8 = por %p3821_p5, %p3820_p2 }
  0x7c   : > { %p3816_p0 = pneg %p3815_p4 }
  0x7e   : > { %p3823_p9 = pnand %p3822_p8, %p3816_p0 }
  0x80   : > { %3826 = shalt.err (!%p3823_p9)
}
  0x81   : > { %s4917_s20 = sld [smem:[#allocation41_spill]]  ;;  %s3838_s28 = scalar_lea.vmem %s584_s19, 256 }
  0x82   : > { %p3839_p11 = scmp.ne.s32.totalorder %s584_s19, %s3838_s28  ;;  %p3846_p13 = scmp.lt.s32.totalorder %s584_s19, %s584_s19 }
  0x83   : > { %p3847_p1 = scmp.lt.s32.totalorder %s3838_s28, %s3838_s28 }
  0x84   : > { %p3841_p10 = pnand %p3839_p11, %p4287_p7 }
  0x85   : > { %p3848_p3 = por %p3847_p1, %p3846_p13 }
  0x86   : > { %p3842_p12 = pneg %p3841_p10 }
  0x87   : > { %3433 = dma.hbm_to_vmem [thread:$0]  (!%p4279_p6), %s4917_s20, 16, %s561_s23, [#allocation6]  }
  0x88   : > { %p3849_p4 = pnand %p3848_p3, %p3842_p12 }
  0x8a   : > { %3852 = shalt.err (!%p3849_p4)
}
  0x8b   : > { %s4918_s7 = sld [smem:[#allocation43_spill]]  ;;  %s4116_s23 = smov [#allocation13]  }
  0x8c   : > { %s610_s30 = sshll.u32 %s4116_s23, 4  ;;  %s4117_s21 = smov [#allocation16]   ;;  %s611_s30 = int_to_ptr.vmem [resolvable:$true] %s610_s30 }
  0x8d   : > { %s634_s4 = sshll.u32 %s4117_s21, 4  ;;  %s3864_s20 = scalar_lea.vmem %s611_s30, 16  ;;  %s635_s4 = int_to_ptr.vmem [resolvable:$true] %s634_s4 }
  0x8e   : > { %p3865_p0 = scmp.ne.s32.totalorder %s611_s30, %s3864_s20  ;;  %s3871_s28 = scalar_lea.vmem %s611_s30, 32 }
  0x8f   : > { %p3872_p8 = scmp.lt.s32.totalorder %s611_s30, %s611_s30  ;;  %p3873_p9 = scmp.lt.s32.totalorder %s3871_s28, %s3864_s20 }
  0x90   : > { %p3867_p2 = pnand %p3865_p0, %p4287_p7 }
  0x91   : > { %3439 = dma.hbm_to_vmem [thread:$0]  (!%p4279_p6), %s4918_s7, 256, %s584_s19, [#allocation9], %s4108_s24, %s4108_s24, %s4109_s3  }
  0x92   : > { %p3868_p5 = pneg %p3867_p2  ;;  %p3874_p11 = por %p3873_p9, %p3872_p8 }
  0x94   : > { %p3875_p10 = pnand %p3874_p11, %p3868_p5 }
  0x96   : > { %3878 = shalt.err (!%p3875_p10)
}
  0x97   : > { %s4919_s9 = sld [smem:[#allocation45_spill]]  ;;  %s3890_s6 = scalar_lea.vmem %s635_s4, 256 }
  0x98   : > { %p3891_p12 = scmp.ne.s32.totalorder %s635_s4, %s3890_s6  ;;  %p3898_p3 = scmp.lt.s32.totalorder %s635_s4, %s635_s4 }
  0x99   : > { %p3899_p4 = scmp.lt.s32.totalorder %s3890_s6, %s3890_s6 }
  0x9a   : > { %p3893_p13 = pnand %p3891_p12, %p4287_p7 }
  0x9b   : > { %p3900_p0 = por %p3899_p4, %p3898_p3 }
  0x9c   : > { %p3894_p1 = pneg %p3893_p13 }
  0x9d   : > { %3445 = dma.hbm_to_vmem [thread:$0]  (!%p4279_p6), %s4919_s9, 16, %s611_s30, [#allocation12]  }
  0x9e   : > { %p3901_p2 = pnand %p3900_p0, %p3894_p1 }
  0xa0   : > { %3904 = shalt.err (!%p3901_p2)
}
  0xa1   : > { %s4920_s12 = sld [smem:[#allocation47_spill]]  ;;  %s4118_s30 = smov [#allocation19]  }
  0xa2   : > { %s660_s20 = sshll.u32 %s4118_s30, 4  ;;  %s4119_s28 = smov [#allocation22]   ;;  %s661_s20 = int_to_ptr.vmem [resolvable:$true] %s660_s20 }
  0xa3   : > { %s685_s22 = sshll.u32 %s4119_s28, 4  ;;  %s3916_s19 = scalar_lea.vmem %s661_s20, 256  ;;  %s686_s22 = int_to_ptr.vmem [resolvable:$true] %s685_s22 }
  0xa4   : > { %p3917_p5 = scmp.ne.s32.totalorder %s661_s20, %s3916_s19  ;;  %p3924_p11 = scmp.lt.s32.totalorder %s661_s20, %s661_s20 }
  0xa5   : > { %p3925_p10 = scmp.lt.s32.totalorder %s3916_s19, %s3916_s19 }
  0xa6   : > { %p3919_p8 = pnand %p3917_p5, %p4287_p7 }
  0xa7   : > { %3451 = dma.hbm_to_vmem [thread:$0]  (!%p4279_p6), %s4920_s12, 256, %s635_s4, [#allocation15], %s4108_s24, %s4108_s24, %s4109_s3  }
  0xa8   : > { %p3920_p9 = pneg %p3919_p8  ;;  %p3926_p12 = por %p3925_p10, %p3924_p11 }
  0xaa   : > { %p3927_p13 = pnand %p3926_p12, %p3920_p9 }
  0xac   : > { %3930 = shalt.err (!%p3927_p13)
}
  0xad   : > { %s4921_s14 = sld [smem:[#allocation49_spill]]  ;;  %s3942_s23 = scalar_lea.vmem %s686_s22, 16 }
  0xae   : > { %p3943_p1 = scmp.ne.s32.totalorder %s686_s22, %s3942_s23  ;;  %s3949_s21 = scalar_lea.vmem %s686_s22, 32 }
  0xaf   : > { %p3950_p0 = scmp.lt.s32.totalorder %s686_s22, %s686_s22  ;;  %p3951_p2 = scmp.lt.s32.totalorder %s3949_s21, %s3942_s23 }
  0xb0   : > { %p3945_p3 = pnand %p3943_p1, %p4287_p7 }
  0xb1   : > { %p3952_p5 = por %p3951_p2, %p3950_p0 }
  0xb2   : > { %p3946_p4 = pneg %p3945_p3 }
  0xb3   : > { %3457 = dma.hbm_to_vmem [thread:$0]  (!%p4279_p6), %s4921_s14, 256, %s661_s20, [#allocation18], %s4108_s24, %s4108_s24, %s4109_s3  }
  0xb4   : > { %p3953_p8 = pnand %p3952_p5, %p3946_p4 }
  0xb6   : > { %3956 = shalt.err (!%p3953_p8)
}
  0xb7   : > { %3463 = dma.hbm_to_vmem [thread:$0]  (!%p4279_p6), %s4879_s16, 16, %s686_s22, [#allocation21]  }
  0xb8   : > { %s4120_s24 = smov [#allocation25]  }
  0xb9   : > { %s709_s3 = sshll.u32 %s4120_s24, 4  ;;  %s710_s3 = int_to_ptr.vmem [resolvable:$true] %s709_s3 }
  0xba   : > { %s3968_s20 = scalar_lea.vmem %s710_s3, 16  ;;  %s3975_s19 = scalar_lea.vmem %s710_s3, 32 }
  0xbb   : > { %p3969_p9 = scmp.ne.s32.totalorder %s710_s3, %s3968_s20  ;;  %p3976_p12 = scmp.lt.s32.totalorder %s710_s3, %s710_s3 }
  0xbc   : > { %p3977_p13 = scmp.lt.s32.totalorder %s3975_s19, %s3968_s20 }
  0xbd   : > { %p3971_p11 = pnand %p3969_p9, %p4287_p7 }
  0xbe   : > { %p3978_p1 = por %p3977_p13, %p3976_p12 }
  0xbf   : > { %p3972_p10 = pneg %p3971_p11 }
  0xc1   : > { %p3979_p3 = pnand %p3978_p1, %p3972_p10 }
  0xc3   : > { %3982 = shalt.err (!%p3979_p3)
}
  0xc4   : > { %3469 = dma.hbm_to_vmem [thread:$0]  (!%p4279_p6), %s4881_s18, 16, %s710_s3, [#allocation24]  }
  0xc5   : > { %s2994_s1 = sadd.s32 4294967294, %s4103_s27   ;;  %s4422_s5 = sadd.s32 1, %s4103_s27  }
  0xc6   : > { %s126_s22 = ssub.s32 %s4103_s27, %s4422_s5  ;;  %s129_s23 = sadd.s32 1, %s4099_s26 }
  0xc7   : > { %p127_p7 = scmp.eq.s32.totalorder %s126_s22, 0  ;;  %p136_p4 = scmp.ne.s32.totalorder %s4099_s26, %s4095_s25 }
  0xc8   : > { %p137_p0 = scmp.eq.s32.totalorder %s4103_s27, 0  ;;  %p142_p2 = scmp.ne.s32.totalorder %s4095_s25, %s4091_s2 }
  0xc9   : > { %s4433_s21 = scalar_select %p127_p7, %s4099_s26, %s129_s23  }
  0xca   : > { %p4435_p5 = por %p137_p0, %p136_p4  ;;  %p4923_p8 = scmp.eq.s32.totalorder %s4263_s29, 0 }
  0xcb   : > { %p523_p9 = scmp.eq.s32.totalorder %s4263_s29, 1  ;;  %p529_p11 = scmp.eq.s32.totalorder %s2994_s1, 1 }
  0xcc   : > { %p4441_p6 = por %p4923_p8, %p142_p2  ;;  %p3492_p10 = scmp.lt.s32.totalorder %s4103_s27, 2 }
  0xcd   : > { %s747_s24 = sand.u32 1, %s4099_s26   ;;  %p4448_p12 = por %p523_p9, %p136_p4 }
  0xce   : > { %s4924_s28 = scalar_select %p4441_p6, 1, 0 }
  0xcf   : > { %s4925_s3 = scalar_select %p4448_p12, 1, 0 }
  0xd0   : > { %p4452_p13 = por %p529_p11, %p142_p2  ;;  %s3011_s19 = sshll.u32 %s747_s24, 3 }
  0xd1   : > { %s3012_s4 = sshll.u32 %s4103_s27, 7  ;;  %s4927_s23 = sld [smem:[#allocation39_spill]] }
  0xd2   : > { %s4926_s20 = scalar_select %p4452_p13, 1, 0 }
  0xd3   : > { %s751_s1 = scalar_lea.vmem [#allocation2], %s3011_s19  ;;  %p4464_p1 = pnand %p3492_p10, %p4435_p5 }
  0xd4   : > { %s758_s8 = sshll.u32 %s751_s1, 4  ;;  %s748_s10 = scalar_lea.sflag [#allocation3], %s747_s24  ;;  %s759_s8 = int_to_ptr.vmem [resolvable:$true] %s758_s8 }
  0xd5   : > { %p3985_p7 = pneg %p4464_p1 }
  0xd7   : > { %s4460_s7 = scalar_lea.hbm %s4927_s23, %s3012_s4  ;;  %s3988_s22 = scalar_lea.hbm %s4927_s23, 256 }
  0xd8   : > { %s3983_s12 = scalar_lea.hbm %s4460_s7, 128  ;;  %p3989_p2 = scmp.lt.s32.totalorder %s4460_s7, %s4927_s23 }
  0xd9   : > { %p3984_p3 = scmp.ne.s32.totalorder %s4460_s7, %s3983_s12  ;;  %p3990_p5 = scmp.lt.s32.totalorder %s3988_s22, %s3983_s12 }
  0xdb   : > { %p3986_p4 = pnand %p3985_p7, %p3984_p3  ;;  %p3991_p8 = por %p3990_p5, %p3989_p2 }
  0xdd   : > { %p3987_p0 = pneg %p3986_p4 }
  0xdf   : > { %p3992_p9 = pnand %p3991_p8, %p3987_p0 }
  0xe1   : > { %3995 = shalt.err (!%p3992_p9)
}
  0xe2   : > { %s3996_s30 = scalar_lea.vmem %s759_s8, 128  ;;  %s4121_s24 = smov [#allocation2]  }
  0xe3   : > { %p3997_p11 = scmp.ne.s32.totalorder %s759_s8, %s3996_s30  ;;  %s4001_s13 = sshll.u32 %s4121_s24, 4  ;;  %s4002_s13 = int_to_ptr.vmem [resolvable:$false] %s4001_s13 }
  0xe4   : > { %s4003_s14 = scalar_lea.vmem %s4002_s13, 256  ;;  %p4004_p3 = scmp.lt.s32.totalorder %s759_s8, %s4002_s13 }
  0xe5   : > { %p3999_p10 = pnand %p3997_p11, %p3985_p7  ;;  %p4005_p4 = scmp.lt.s32.totalorder %s4003_s14, %s3996_s30 }
  0xe7   : > { %p4000_p13 = pneg %p3999_p10  ;;  %p4006_p12 = por %p4005_p4, %p4004_p3 }
  0xe9   : > { %p4007_p6 = pnand %p4006_p12, %p4000_p13 }
  0xeb   : > { %4010 = shalt.err (!%p4007_p6)
}
  0xec   : > { %3473 = dma.hbm_to_vmem [thread:$0]  (!%p4464_p1), %s4460_s7, 128, %s759_s8, %s748_s10  }
  0xed   : > { %p4929_p0 = scmp.ne.s32.totalorder %s4909_s0, 0 }
  0xee   : > { %s4485_s12 = sand.u32 (!%p4929_p0), 1, %s4095_s25   ;;  %p4930_p6 = scmp.ne.s32.totalorder (!%p4929_p0), %s4924_s28, 0 }
  0xef   : > { %767 = sbr.rel (%p4929_p0) target bundleno = 6502 (0x1966), region = 104  ;;  %s3014_s4 = sshll.u32 (!%p4929_p0), %s4485_s12, 3 }
  0xf0   : > { %s770_s13 = scalar_lea.sflag (!%p4929_p0), [#allocation3], %s4485_s12  ;;  %s4491_s14 = scalar_lea.vmem (!%p4929_p0), [#allocation2], %s3014_s4 }
  0xf4   : > { %4054 = dma.done.wait (%p4930_p6), %s770_s13, 128  }
  0xf5   : > { %4056 = vsyncadd (%p4930_p6), %s770_s13, 4294967168  ;;  %p4931_p12 = scmp.eq.s32.totalorder %s4263_s29, 0 }
  0xf7   : > { %4058 = dma.done.wait (%p4931_p12), [#allocation6], 32   ;;  %p4932_p13 = pmov %p4931_p12 }
  0xf8   : > { %p4933_p1 = pmov %p4931_p12 }
  0xf9   : > { %4060 = vsyncadd (%p4932_p13), [#allocation6], 4294967264 }
  0xfa   : > { %4062 = dma.done.wait (%p4933_p1), [#allocation9], 512   ;;  %p4934_p7 = pmov %p4933_p1 }
  0xfb   : > { %p4935_p2 = pmov %p4933_p1 }
  0xfc   : > { %4064 = vsyncadd (%p4934_p7), [#allocation9], 4294966784 }
  0xfd   : > { %4066 = dma.done.wait (%p4935_p2), [#allocation12], 272   ;;  %p4936_p5 = pmov %p4933_p1 }
  0xfe   : > { %p4937_p8 = pmov %p4933_p1 }
  0xff   : > { %4068 = vsyncadd (%p4936_p5), [#allocation12], 4294967024 }
 0x100   : > { %4070 = dma.done.wait (%p4937_p8), [#allocation15], 272   ;;  %p4938_p9 = pmov %p4933_p1 }
 0x101   : > { %p4939_p11 = pmov %p4933_p1 }
 0x102   : > { %4072 = vsyncadd (%p4938_p9), [#allocation15], 4294967024 }
 0x103   : > { %4074 = dma.done.wait (%p4939_p11), [#allocation18], 512   ;;  %p4940_p10 = pmov %p4933_p1 }
 0x104   : > { %p4941_p3 = pmov %p4933_p1 }
 0x105   : > { %4076 = vsyncadd (%p4940_p10), [#allocation18], 4294966784 }
 0x106   : > { %4078 = dma.done.wait (%p4941_p3), [#allocation21], 32   ;;  %p4942_p4 = pmov %p4933_p1 }
 0x107   : > { %p4943_p0 = pmov %p4933_p1 }
 0x108   : > { %4080 = vsyncadd (%p4942_p4), [#allocation21], 4294967264 }
 0x109   : > { %4082 = dma.done.wait (%p4943_p0), [#allocation24], 272   ;;  %p4944_p6 = pmov %p4943_p0 }
 0x10a   : > { %p900_p12 = scmp.lt.s32.totalorder %s4263_s29, 1  ;;  %s4945_s0 = sld [smem:[#allocation36_spill]]  ;;  %vm919_vm0 = vcmask 261120   ;;  %v3565_v7 = vld [vmem:[#allocation8 + $0x8] sm:$0xff]   ;;  %v4122_v8 = vmov 0.0   ;;  %vm4123_vm1 = vmmov 0  }
 0x10b   : > { %4084 = vsyncadd (%p4944_p6), [#allocation24], 4294967024  ;;  %3163 = vmatprep.subr.bf16.mxu1 %v4122_v8  ;;  %3167 = vmatprep.mubr.msk.bf16.mxu1 %vm4123_vm1, %v4122_v8  ;;  %v3566_v9 = vld [vmem:[#allocation8] sm:$0xff]   ;;  %v3033_v14 = vld [vmem:[#allocation5] ss:$0 sm:$0xff]  ;;  %s4946_s19 = sld [smem:[#allocation38_spill]] }
 0x10c   : > { %s901_s7 = scalar_select %p900_p12, %s4263_s29, 1  ;;  %3164 = vmatpush3.bf16.msra.mxu1 %v3565_v7  ;;  %3179 = vmatprep.subr.bf16.mxu0 %v4122_v8  ;;  %v3034_v16 = vld [vmem:[#allocation7] ss:$0 sm:$0xff]  ;;  %v3568_v23 = vld [vmem:[#allocation10] sm:$0xff]   ;;  %vm1136_vm2 = vcmask 1043456   ;;  %vm1074_vm3 = vcmask 64512  }
 0x10d   : > { %3165 = vmatprep.subr.bf16.mxu1 %v4122_v8  ;;  %3181 = vmatprep.mubr.msk.bf16.mxu0 %vm4123_vm1, %v4122_v8  ;;  %v3567_v21 = vld [vmem:[#allocation10 + $0x8] sm:$0xff]   ;;  %s4124_s30 = smov 120   ;;  %s4125_s24 = smov 96   ;;  %vm2695_vm4 = vcmask 523264  }
 0x10e   : > { %s4527_s8 = sshll.u32 %s901_s7, 3  ;;  %s4126_s13 = smov 88  }
 0x10f   : > { %s4127_s7 = smov 80   ;;  %s4128_s9 = smov 112  }
 0x110   : > { %s903_s28 = scalar_lea.vmem %s4945_s0, %s4527_s8  ;;  %3166 = vmatpush3.bf16.msra.mxu1 %v3566_v9  ;;  %v1181_v9 = vld [vmem:[#allocation11] sm:$0xf]  ;;  %s4129_s10 = smov 104  }
 0x111   : > { %v4533_v0 = vld [vmem:[%s903_s28] sm:$0xff]  ;;  %3171 = vmatprep.subr.bf16.mxu1 %v4122_v8  ;;  %s911_s1 = scalar_lea.vmem %s4946_s19, %s4527_s8  ;;  %s4130_s0 = smov 72  }
 0x112   : > { %v920_v1 = vsel %vm919_vm0, %v4533_v0, 0.0  ;;  %v4551_v18 = vld [vmem:[%s911_s1] sm:$0xff]  ;;  %s4947_s22 = sld [smem:[#allocation37_spill]]  ;;  %p4951_p1 = scmp.ne.s32.totalorder %s4925_s3, 0 }
 0x113   : > { %921 = vadd.xlane.f32.xlu0 %v920_v1  ;;  %s4131_s28 = smov [#allocation26]  }
 0x114   : > { %s4015_s6 = sshll.u32 %s4131_s28, 4  ;;  %s4016_s6 = int_to_ptr.vmem [resolvable:$false] %s4015_s6 }
 0x118   : > { %s907_s19 = scalar_lea.vmem %s4947_s22, %s4527_s8  ;;  %s899_s8 = scalar_lea.vmem [#allocation26], %s3014_s4 }
 0x119   : > { %s4017_s22 = scalar_lea.vmem %s4016_s6, 256 }
 0x19c   : > { %v922_v2 = vpop.xlane.xlu0 %921 }
 0x19d   : > { %v924_v3 = vmul.f32 0.03125, %v922_v2 }
 0x19f   : > { %v925_v4 = vsub.f32 %v4533_v0, %v924_v3 }
 0x1a1   : > { %v926_v5 = vmul.f32 %v925_v4, %v925_v4 }
 0x1a3   : > { %v927_v6 = vsel %vm919_vm0, %v926_v5, 0.0 }
 0x1a4   : > { %928 = vadd.xlane.f32.xlu0 %v927_v6 }
 0x22d   : > { %v929_v10 = vpop.xlane.xlu0 %928 }
 0x22e   : > { %v930_v11 = vmul.f32 0.03125, %v929_v10  ;;  %v1346_v10 = vsel %vm1136_vm2, %v1181_v9, 0 }
 0x230   : > { %v931_v12 = vadd.f32 1e-07, %v930_v11  ;;  %v1295_v11 = vld [vmem:[#allocation11 + $0x4] sm:$0xf] }
 0x232   : > { %3581 = vrsqrt.f32 %v931_v12  ;;  %v1300_v12 = vsel %vm1136_vm2, %v1295_v11, 0 }
 0x23f   : > { %v3582_v13 = vpop.eup %3581 }
 0x240   : > { %v933_v15 = vmul.f32 %v3582_v13, %v925_v4 }
 0x242   : > { %v940_v17 = vmul.f32 %v3033_v14, %v933_v15 }
 0x244   : > { %v947_v19 = vadd.f32 %v3034_v16, %v940_v17 }
 0x246   : > { %v948_v20 = vadd.f32 %v947_v19, %v4551_v18  ;;  %v1009_v24 = vpack.c.bf16 %v947_v19, %v947_v19 }
 0x248   : > { %v949_v22 = vpack.c.bf16 %v948_v20, %v948_v20 }
 0x24a   : > { %3168 = vmatmul.mubr.msk.bf16.vlgmr.msra.gmra.mxu1 %vm919_vm0, %v949_v22 }
 0x24b   : > { %3172 = vmatpush3.bf16.msra.mxu1 %v3567_v21  ;;  %3175 = vmatprep.mubr.msk.bf16.mxu1 %vm4123_vm1, %v4122_v8 }
 0x24c   : > { %3173 = vmatprep.subr.bf16.mxu1 %v4122_v8 }
 0x24f   : > { %3174 = vmatpush3.bf16.msra.mxu1 %v3568_v23 }
 0x250   : > { %3185 = vmatprep.subr.bf16.mxu1 %v4122_v8 }
 0x252   : > { %3176 = vmatmul.mubr.msk.bf16.vlgmr.msra.gmra.mxu1 %vm919_vm0, %v1009_v24 }
 0x253   : > { %3187 = vmatprep.mubr.msk.bf16.mxu1 %vm4123_vm1, %v4122_v8 }
 0x30a   : > { %v1003_v25 = vpop.f32.mrf.mxu1 }
 0x30b   : > { %v4562_v26 = vpack.c.bf16 %v1003_v25, %v1003_v25 }
 0x30c   : > { %v3169_v27 = vpop.f32.mrf.mxu1 }
 0x30d   : > { %1182 = vrot.lane.b32.xlu0 %v4562_v26, %s4124_s30  ;;  %1072 = vrot.lane.b32.xlu1 %v4562_v26, %s4125_s24  ;;  %s4949_s24 = sld [smem:[#allocation51_spill]] }
 0x30e   : > { %v1006_v28 = vpop.f32.mrf.mxu1 }
 0x310   : > { %v3170_v29 = vpop.f32.mrf.mxu1 }
 0x311   : > { %1184 = vrot.lane.b32.xlu1 %v4562_v26, %s4126_s13 }
 0x312   : > { %v1063_v30 = vpop.f32.mrf.mxu1 }
 0x313   : > { %v4568_v31 = vpack.c.bf16 %v1063_v30, %v1063_v30 }
 0x314   : > { %v3177_v32 = vpop.f32.mrf.mxu1 }
 0x315   : > { %v1138_v33 = vsel %vm1136_vm2, %v4568_v31, 0 }
 0x316   : > { %v1066_v34 = vpop.f32.mrf.mxu1  ;;  %3186 = vmatpush3.bf16.msra.mxu1 %v1138_v33 }
 0x317   : > { %3197 = vmatprep.subr.bf16.mxu1 %v4122_v8 }
 0x318   : > { %v3178_v35 = vpop.f32.mrf.mxu1 }
 0x37f   : > { %v1073_v36 = vpop.permute.xlu1 %1072  ;;  %v1183_v40 = vpop.permute.xlu0 %1182 }
 0x380   : > { %v1079_v37 = vsel %vm1074_vm3, %v1073_v36, 0 }
 0x381   : > { %3180 = vmatpush3.bf16.xpose.msra.mxu0 %v1079_v37 }
 0x382   : > { %3191 = vmatprep.subr.bf16.mxu0 %v4122_v8 }
 0x383   : > { %v1185_v38 = vpop.permute.xlu1 %1184 }
 0x384   : > { %v1190_v39 = vsel %vm1074_vm3, %v1185_v38, 0 }
 0x388   : > { %3182 = vmatmul.mubr.msk.bf16.vlgmr.msra.gmra.mxu0 %vm1074_vm3, %v4562_v26 }
 0x389   : > { %3192 = vmatpush3.bf16.xpose.msra.mxu0 %v1190_v39  ;;  %3193 = vmatprep.mubr.msk.bf16.mxu0 %vm4123_vm1, %v4122_v8 }
 0x38a   : > { %3203 = vmatprep.subr.bf16.mxu0 %v4122_v8 }
 0x390   : > { %3194 = vmatmul.mubr.msk.bf16.vlgmr.msra.gmra.mxu0 %vm1074_vm3, %v1183_v40 }
 0x391   : > { %3205 = vmatprep.mubr.msk.bf16.mxu0 %vm4123_vm1, %v4122_v8  ;;  %3204 = vmatpush3.bf16.msra.mxu0 %v1300_v12 }
 0x392   : > { %3215 = vmatprep.subr.bf16.mxu0 %v4122_v8 }
 0x448   : > { %v1115_v41 = vpop.f32.mrf.mxu0 }
 0x449   : > { %v1121_v42 = vsel %vm1074_vm3, %v1115_v41, -inf }
 0x44a   : > { %1122 = vmax.xlane.f32.xlu1 %v1121_v42  ;;  %v3183_v43 = vpop.f32.mrf.mxu0 }
 0x44c   : > { %v1118_v44 = vpop.f32.mrf.mxu0 }
 0x44e   : > { %v3184_v45 = vpop.f32.mrf.mxu0 }
 0x450   : > { %v1226_v46 = vpop.f32.mrf.mxu0 }
 0x451   : > { %v1232_v47 = vsel %vm1074_vm3, %v1226_v46, -inf }
 0x452   : > { %1233 = vmax.xlane.f32.xlu0 %v1232_v47  ;;  %v3195_v48 = vpop.f32.mrf.mxu0 }
 0x454   : > { %v1229_v49 = vpop.f32.mrf.mxu0 }
 0x456   : > { %v3196_v50 = vpop.f32.mrf.mxu0 }
 0x468   : > { %1390 = vrot.lane.b32.xlu0 %v4562_v26, %s4127_s7  ;;  %s4948_s7 = sld [smem:[#allocation50_spill]] }
 0x4d3   : > { %v1123_v51 = vpop.xlane.xlu1 %1122 }
 0x4d4   : > { %v1124_v52 = vsub.f32 %v1115_v41, %v1123_v51 }
 0x4d6   : > { %v1125_v53 = vmul.f32 1.442695, %v1124_v52 }
 0x4d8   : > { %3583 = vpow2.f32 %v1125_v53 }
 0x4db   : > { %v1234_v54 = vpop.xlane.xlu0 %1233 }
 0x4dc   : > { %v1235_v55 = vsub.f32 %v1226_v46, %v1234_v54 }
 0x4de   : > { %v1236_v56 = vmul.f32 1.442695, %v1235_v55 }
 0x4df   : > { %v1391_v19 = vpop.permute.xlu0 %1390 }
 0x4e0   : > { %3585 = vpow2.f32 %v1236_v56  ;;  %v1396_v23 = vsel %vm1074_vm3, %v1391_v19, 0 }
 0x4e5   : > { %v3584_v57 = vpop.eup %3583 }
 0x4e6   : > { %v1127_v58 = vsel %vm1074_vm3, %v3584_v57, 0.0 }
 0x4e7   : > { %1128 = vadd.xlane.f32.xlu1 %v1127_v58 }
 0x4ed   : > { %v3586_v59 = vpop.eup %3585 }
 0x4ee   : > { %v1238_v60 = vsel %vm1074_vm3, %v3586_v59, 0.0 }
 0x4ef   : > { %1239 = vadd.xlane.f32.xlu1 %v1238_v60 }
 0x500   : > { %1245 = vrot.lane.b32.xlu1 %v4568_v31, %s4124_s30 }
 0x504   : > { %1388 = vrot.lane.b32.xlu1 %v4562_v26, %s4128_s9 }
 0x570   : > { %v1129_v61 = vpop.xlane.xlu1 %1128 }
 0x571   : > { %3587 = vrcp.f32 %v1129_v61 }
 0x578   : > { %v1240_v62 = vpop.xlane.xlu1 %1239 }
 0x579   : > { %3589 = vrcp.f32 %v1240_v62 }
 0x57c   : > { %v1246_v2 = vpop.permute.xlu1 %1245 }
 0x57d   : > { %v1251_v4 = vsel %vm1136_vm2, %v1246_v2, 0 }
 0x57e   : > { %v3588_v63 = vpop.eup %3587 }
 0x57f   : > { %v1131_v1 = vmul.f32 %v3588_v63, %v3584_v57 }
 0x580   : > { %v1389_v27 = vpop.permute.xlu1 %1388 }
 0x581   : > { %v1132_v3 = vpack.c.bf16 %v1131_v1, %v1131_v1 }
 0x583   : > { %3188 = vmatmul.mubr.msk.bf16.vlgmr.msra.gmra.mxu1 %vm1074_vm3, %v1132_v3 }
 0x584   : > { %3198 = vmatpush3.bf16.msra.mxu1 %v1251_v4  ;;  %3199 = vmatprep.mubr.msk.bf16.mxu1 %vm4123_vm1, %v4122_v8 }
 0x585   : > { %3209 = vmatprep.subr.bf16.mxu1 %v4122_v8 }
 0x586   : > { %v3590_v5 = vpop.eup %3589 }
 0x587   : > { %v1242_v6 = vmul.f32 %v3590_v5, %v3586_v59 }
 0x589   : > { %v1243_v7 = vpack.c.bf16 %v1242_v6, %v1242_v6 }
 0x58b   : > { %3200 = vmatmul.mubr.msk.bf16.vlgmr.msra.gmra.mxu1 %vm1074_vm3, %v1243_v7 }
 0x58c   : > { %3211 = vmatprep.mubr.msk.bf16.mxu1 %vm4123_vm1, %v4122_v8  ;;  %3210 = vmatpush3.bf16.msra.mxu1 %v1346_v10 }
 0x58d   : > { %3221 = vmatprep.subr.bf16.mxu1 %v4122_v8 }
 0x643   : > { %v1174_v13 = vpop.f32.mrf.mxu1 }
 0x644   : > { %v1180_v14 = vpack.c.bf16 %v1174_v13, %v1174_v13 }
 0x645   : > { %v3189_v15 = vpop.f32.mrf.mxu1 }
 0x646   : > { %3212 = vmatmul.mubr.msk.bf16.vlgmr.msra.gmra.mxu1 %vm1074_vm3, %v1180_v14  ;;  %v1660_v14 = vld [vmem:[#allocation11 + $0xc] sm:$0xf] }
 0x647   : > { %v1177_v16 = vpop.f32.mrf.mxu1  ;;  %3223 = vmatprep.mubr.msk.bf16.mxu1 %vm4123_vm1, %v4122_v8 }
 0x649   : > { %v3190_v17 = vpop.f32.mrf.mxu1 }
 0x64b   : > { %v1287_v20 = vpop.f32.mrf.mxu1 }
 0x64c   : > { %v1293_v21 = vpack.c.bf16 %v1287_v20, %v1287_v20 }
 0x64d   : > { %v3201_v22 = vpop.f32.mrf.mxu1 }
 0x64e   : > { %3206 = vmatmul.mubr.msk.bf16.vlgmr.msra.gmra.mxu0 %vm1074_vm3, %v1293_v21 }
 0x64f   : > { %3216 = vmatpush3.bf16.xpose.msra.mxu0 %v1396_v23  ;;  %v1290_v24 = vpop.f32.mrf.mxu1  ;;  %3217 = vmatprep.mubr.msk.bf16.mxu0 %vm4123_vm1, %v4122_v8 }
 0x650   : > { %3227 = vmatprep.subr.bf16.mxu0 %v4122_v8 }
 0x651   : > { %v3202_v25 = vpop.f32.mrf.mxu1 }
 0x656   : > { %3218 = vmatmul.mubr.msk.bf16.vlgmr.msra.gmra.mxu0 %vm1074_vm3, %v1389_v27 }
 0x657   : > { %3229 = vmatprep.mubr.msk.bf16.mxu0 %vm4123_vm1, %v4122_v8 }
 0x706   : > { %v1382_v28 = vpop.f32.mrf.mxu1 }
 0x708   : > { %v3213_v29 = vpop.f32.mrf.mxu1 }
 0x70a   : > { %v1385_v30 = vpop.f32.mrf.mxu1 }
 0x70c   : > { %v3214_v32 = vpop.f32.mrf.mxu1 }
 0x70e   : > { %v1336_v33 = vpop.f32.mrf.mxu0 }
 0x70f   : > { %v4616_v34 = vadd.f32 %v1382_v28, %v1336_v33 }
 0x710   : > { %v3207_v35 = vpop.f32.mrf.mxu0 }
 0x712   : > { %v1339_v36 = vpop.f32.mrf.mxu0 }
 0x714   : > { %v3208_v37 = vpop.f32.mrf.mxu0 }
 0x716   : > { %v1432_v38 = vpop.f32.mrf.mxu0 }
 0x717   : > { %v1438_v39 = vsel %vm1074_vm3, %v1432_v38, -inf }
 0x718   : > { %1439 = vmax.xlane.f32.xlu1 %v1438_v39  ;;  %v3219_v40 = vpop.f32.mrf.mxu0 }
 0x71a   : > { %v1435_v41 = vpop.f32.mrf.mxu0 }
 0x71c   : > { %v3220_v42 = vpop.f32.mrf.mxu0 }
 0x729   : > { %1450 = vrot.lane.b32.xlu1 %v4568_v31, %s4128_s9 }
 0x72d   : > { %1548 = vrot.lane.b32.xlu1 %v4562_v26, %s4129_s10 }
 0x7a1   : > { %v1440_v43 = vpop.xlane.xlu1 %1439 }
 0x7a2   : > { %v1441_v44 = vsub.f32 %v1432_v38, %v1440_v43  ;;  %v916_v43 = vld [vmem:[%s4491_s14] sm:$0xff]  ;;  %s3089_s14 = sshll.u32 %s4263_s29, 7  ;;  %s2742_s29 = scalar_lea.sflag [#allocation4], %s4485_s12 }
 0x7a4   : > { %v1442_v45 = vmul.f32 1.442695, %v1441_v44  ;;  %v3569_v44 = vld [vmem:[#allocation16 + $0x8] sm:$0xff]  }
 0x7a5   : > { %v1451_v46 = vpop.permute.xlu1 %1450 }
 0x7a6   : > { %3591 = vpow2.f32 %v1442_v45  ;;  %v1456_v47 = vsel %vm1136_vm2, %v1451_v46, 0  ;;  %v3570_v46 = vld [vmem:[#allocation16] sm:$0xff]  }
 0x7a7   : > { %3222 = vmatpush3.bf16.msra.mxu1 %v1456_v47 }
 0x7a8   : > { %3233 = vmatprep.subr.bf16.mxu1 %v4122_v8 }
 0x7a9   : > { %v1549_v56 = vpop.permute.xlu1 %1548 }
 0x7b3   : > { %v3592_v48 = vpop.eup %3591 }
 0x7b4   : > { %v1444_v49 = vsel %vm1074_vm3, %v3592_v48, 0.0 }
 0x7b5   : > { %1445 = vadd.xlane.f32.xlu0 %v1444_v49  ;;  %v3572_v49 = vld [vmem:[%s4874_s11] sm:$0xff]  }
 0x7cb   : > { %1550 = vrot.lane.b32.xlu0 %v4562_v26, %s4130_s0  ;;  %v1500_v26 = vld [vmem:[#allocation11 + $0x8] sm:$0xf] }
 0x7cc   : > { %v1505_v57 = vsel %vm1136_vm2, %v1500_v26, 0 }
 0x7cd   : > { %3228 = vmatpush3.bf16.msra.mxu0 %v1505_v57 }
 0x7ce   : > { %3239 = vmatprep.subr.bf16.mxu0 %v4122_v8 }
 0x83e   : > { %v1446_v50 = vpop.xlane.xlu0 %1445 }
 0x83f   : > { %3593 = vrcp.f32 %v1446_v50 }
 0x842   : > { %v1551_v53 = vpop.permute.xlu0 %1550 }
 0x843   : > { %v1556_v55 = vsel %vm1074_vm3, %v1551_v53, 0 }
 0x84c   : > { %v3594_v51 = vpop.eup %3593 }
 0x84d   : > { %v1448_v52 = vmul.f32 %v3594_v51, %v3592_v48  ;;  %v3571_v48 = vld [vmem:[%s4874_s11 + $0x8] sm:$0xff]  }
 0x84f   : > { %v1449_v54 = vpack.c.bf16 %v1448_v52, %v1448_v52 }
 0x851   : > { %3224 = vmatmul.mubr.msk.bf16.vlgmr.msra.gmra.mxu1 %vm1074_vm3, %v1449_v54  ;;  %v3053_v54 = vld [vmem:[#allocation13] ss:$0 sm:$0xff] }
 0x852   : > { %3234 = vmatpush3.bf16.xpose.msra.mxu1 %v1556_v55  ;;  %3235 = vmatprep.mubr.msk.bf16.mxu1 %vm4123_vm1, %v4122_v8 }
 0x853   : > { %3245 = vmatprep.subr.bf16.mxu1 %v4122_v8 }
 0x859   : > { %3236 = vmatmul.mubr.msk.bf16.vlgmr.msra.gmra.mxu1 %vm1074_vm3, %v1549_v56  ;;  %v3054_v56 = vld [vmem:[#allocation14] ss:$0 sm:$0xff] }
 0x85a   : > { %3247 = vmatprep.mubr.msk.bf16.mxu1 %vm4123_vm1, %v4122_v8 }
 0x911   : > { %v1492_v58 = vpop.f32.mrf.mxu1 }
 0x912   : > { %v1498_v59 = vpack.c.bf16 %v1492_v58, %v1492_v58 }
 0x913   : > { %v3225_v60 = vpop.f32.mrf.mxu1 }
 0x914   : > { %3230 = vmatmul.mubr.msk.bf16.vlgmr.msra.gmra.mxu0 %vm1074_vm3, %v1498_v59 }
 0x915   : > { %v1495_v61 = vpop.f32.mrf.mxu1  ;;  %3241 = vmatprep.mubr.msk.bf16.mxu0 %vm4123_vm1, %v4122_v8 }
 0x917   : > { %v3226_v62 = vpop.f32.mrf.mxu1 }
 0x919   : > { %v1592_v63 = vpop.f32.mrf.mxu1 }
 0x91a   : > { %v1598_v1 = vsel %vm1074_vm3, %v1592_v63, -inf }
 0x91b   : > { %1599 = vmax.xlane.f32.xlu1 %v1598_v1  ;;  %v3237_v2 = vpop.f32.mrf.mxu1 }
 0x91d   : > { %v1595_v3 = vpop.f32.mrf.mxu1 }
 0x91f   : > { %v3238_v4 = vpop.f32.mrf.mxu1 }
 0x92c   : > { %1610 = vrot.lane.b32.xlu1 %v4568_v31, %s4129_s10  ;;  %v1665_v31 = vsel %vm1136_vm2, %v1660_v14, 0 }
 0x92d   : > { %3246 = vmatpush3.bf16.msra.mxu1 %v1665_v31 }
 0x92e   : > { %3259 = vmatprep.subr.bf16.mxu1 %v4122_v8 }
 0x9a4   : > { %v1600_v5 = vpop.xlane.xlu1 %1599 }
 0x9a5   : > { %v1601_v6 = vsub.f32 %v1592_v63, %v1600_v5 }
 0x9a7   : > { %v1602_v7 = vmul.f32 1.442695, %v1601_v6 }
 0x9a8   : > { %v1611_v9 = vpop.permute.xlu1 %1610 }
 0x9a9   : > { %3595 = vpow2.f32 %v1602_v7  ;;  %v1616_v10 = vsel %vm1136_vm2, %v1611_v9, 0 }
 0x9aa   : > { %3240 = vmatpush3.bf16.msra.mxu0 %v1616_v10  ;;  %v3573_v10 = vld [vmem:[#allocation17 + $0x8] sm:$0xff]  }
 0x9ab   : > { %3251 = vmatprep.subr.bf16.mxu0 %v4122_v8 }
 0x9b6   : > { %v3596_v11 = vpop.eup %3595 }
 0x9b7   : > { %v1604_v12 = vsel %vm1074_vm3, %v3596_v11, 0.0 }
 0x9b8   : > { %1605 = vadd.xlane.f32.xlu0 %v1604_v12 }
 0x9d4   : > { %v1541_v13 = vpop.f32.mrf.mxu0 }
 0x9d5   : > { %v1547_v15 = vadd.f32 %v1541_v13, %v4616_v34 }
 0x9d6   : > { %v3231_v16 = vpop.f32.mrf.mxu0 }
 0x9d8   : > { %v1544_v17 = vpop.f32.mrf.mxu0 }
 0x9da   : > { %v3232_v19 = vpop.f32.mrf.mxu0 }
 0xa41   : > { %v1606_v20 = vpop.xlane.xlu0 %1605 }
 0xa42   : > { %3597 = vrcp.f32 %v1606_v20 }
 0xa4f   : > { %v3598_v21 = vpop.eup %3597 }
 0xa50   : > { %v1608_v22 = vmul.f32 %v3598_v21, %v3596_v11  ;;  %v3574_v11 = vld [vmem:[#allocation17] sm:$0xff]  }
 0xa52   : > { %v1609_v23 = vpack.c.bf16 %v1608_v22, %v1608_v22 }
 0xa54   : > { %3242 = vmatmul.mubr.msk.bf16.vlgmr.msra.gmra.mxu0 %vm1074_vm3, %v1609_v23 }
 0xa55   : > { %3255 = vmatprep.mubr.msk.bf16.mxu0 %vm4123_vm1, %v4122_v8  ;;  %3252 = vmatpush3.bf16.msra.mxu0 %v3571_v48  ;;  %v2144_v48 = vld [vmem:[#allocation19 + $0x4] sm:$0xf] }
 0xa56   : > { %3253 = vmatprep.subr.bf16.mxu0 %v4122_v8 }
 0xa59   : > { %3254 = vmatpush3.bf16.msra.mxu0 %v3572_v49  ;;  %v2149_v49 = vsel %vm1136_vm2, %v2144_v48, 0 }
 0xa5a   : > { %3267 = vmatprep.subr.bf16.mxu0 %v4122_v8 }
 0xb14   : > { %v1652_v24 = vpop.f32.mrf.mxu0 }
 0xb15   : > { %v1658_v25 = vpack.c.bf16 %v1652_v24, %v1652_v24 }
 0xb16   : > { %v3243_v27 = vpop.f32.mrf.mxu0 }
 0xb17   : > { %3248 = vmatmul.mubr.msk.bf16.vlgmr.msra.gmra.mxu1 %vm1074_vm3, %v1658_v25 }
 0xb18   : > { %v1655_v28 = vpop.f32.mrf.mxu0  ;;  %3263 = vmatprep.mubr.msk.bf16.mxu1 %vm4123_vm1, %v4122_v8  ;;  %3260 = vmatpush3.bf16.msra.mxu1 %v3569_v44 }
 0xb19   : > { %3261 = vmatprep.subr.bf16.mxu1 %v4122_v8 }
 0xb1a   : > { %v3244_v29 = vpop.f32.mrf.mxu0 }
 0xb1c   : > { %3262 = vmatpush3.bf16.msra.mxu1 %v3570_v46 }
 0xb1d   : > { %3275 = vmatprep.subr.bf16.mxu1 %v4122_v8 }
 0xbd7   : > { %v1701_v30 = vpop.f32.mrf.mxu1 }
 0xbd8   : > { %v1707_v32 = vadd.f32 %v1701_v30, %v1547_v15 }
 0xbd9   : > { %v3249_v33 = vpop.f32.mrf.mxu1 }
 0xbda   : > { %v4656_v34 = vadd.f32 %v1707_v32, %v4533_v0  ;;  %v914_v0 = vld [vmem:[%s907_s19] sm:$0xff] }
 0xbdb   : > { %v1704_v35 = vpop.f32.mrf.mxu1  ;;  %v1799_v45 = vadd.f32 %v916_v43, %v914_v0  ;;  %v1860_v12 = vpack.c.bf16 %v914_v0, %v914_v0 }
 0xbdc   : > { %v1711_v36 = vsel %vm919_vm0, %v4656_v34, 0.0 }
 0xbdd   : > { %1712 = vadd.xlane.f32.xlu0 %v1711_v36  ;;  %v3250_v37 = vpop.f32.mrf.mxu1  ;;  %v1800_v47 = vpack.c.bf16 %v1799_v45, %v1799_v45 }
 0xbdf   : > { %3264 = vmatmul.mubr.msk.bf16.vlgmr.msra.gmra.mxu1 %vm919_vm0, %v1800_v47 }
 0xbe0   : > { %3277 = vmatprep.mubr.msk.bf16.mxu1 %vm4123_vm1, %v4122_v8 }
 0xc66   : > { %v1713_v38 = vpop.xlane.xlu0 %1712 }
 0xc67   : > { %v1714_v39 = vmul.f32 0.03125, %v1713_v38 }
 0xc69   : > { %v1715_v40 = vsub.f32 %v4656_v34, %v1714_v39 }
 0xc6b   : > { %v1716_v41 = vmul.f32 %v1715_v40, %v1715_v40 }
 0xc6d   : > { %v1717_v42 = vsel %vm919_vm0, %v1716_v41, 0.0 }
 0xc6e   : > { %1718 = vadd.xlane.f32.xlu0 %v1717_v42 }
 0xc9f   : > { %v1854_v60 = vpop.f32.mrf.mxu1 }
 0xca0   : > { %v4684_v61 = vpack.c.bf16 %v1854_v60, %v1854_v60 }
 0xca1   : > { %v3265_v62 = vpop.f32.mrf.mxu1 }
 0xca2   : > { %2033 = vrot.lane.b32.xlu0 %v4684_v61, %s4124_s30  ;;  %v1927_v63 = vsel %vm1074_vm3, %v4684_v61, 0 }
 0xca3   : > { %v1857_v1 = vpop.f32.mrf.mxu1  ;;  %3276 = vmatpush3.bf16.xpose.msra.mxu1 %v1927_v63 }
 0xca4   : > { %3287 = vmatprep.subr.bf16.mxu1 %v4122_v8 }
 0xcf7   : > { %v1719_v50 = vpop.xlane.xlu0 %1718 }
 0xcf8   : > { %v1720_v51 = vmul.f32 0.03125, %v1719_v50 }
 0xcfa   : > { %v1721_v52 = vadd.f32 1e-07, %v1720_v51 }
 0xcfc   : > { %3599 = vrsqrt.f32 %v1721_v52  ;;  %v2028_v52 = vld [vmem:[#allocation19] sm:$0xf] }
 0xd09   : > { %v3600_v53 = vpop.eup %3599 }
 0xd0a   : > { %v1723_v55 = vmul.f32 %v3600_v53, %v1715_v40 }
 0xd0c   : > { %v1730_v26 = vmul.f32 %v3053_v54, %v1723_v55  ;;  %v2195_v55 = vsel %vm1136_vm2, %v2028_v52, 0 }
 0xd0e   : > { %v1737_v57 = vadd.f32 %v3054_v56, %v1730_v26 }
 0xd10   : > { %v1738_v58 = vadd.f32 %v1737_v57, %v4551_v18  ;;  %v3266_v18 = vpop.f32.mrf.mxu1 }
 0xd12   : > { %v1739_v59 = vpack.c.bf16 %v1738_v58, %v1738_v58 }
 0xd14   : > { %3256 = vmatmul.mubr.msk.bf16.vlgmr.msra.gmra.mxu0 %vm919_vm0, %v1739_v59  ;;  %v2034_v2 = vpop.permute.xlu0 %2033 }
 0xd15   : > { %3271 = vmatprep.mubr.msk.bf16.mxu0 %vm4123_vm1, %v4122_v8  ;;  %v2039_v5 = vsel %vm1074_vm3, %v2034_v2, 0  ;;  %3268 = vmatpush3.bf16.msra.mxu0 %v3573_v10 }
 0xd16   : > { %3269 = vmatprep.subr.bf16.mxu0 %v4122_v8 }
 0xd19   : > { %3270 = vmatpush3.bf16.msra.mxu0 %v3574_v11 }
 0xd1a   : > { %3281 = vmatprep.subr.bf16.mxu0 %v4122_v8 }
 0xd1c   : > { %3272 = vmatmul.mubr.msk.bf16.vlgmr.msra.gmra.mxu0 %vm919_vm0, %v1860_v12 }
 0xd1d   : > { %3283 = vmatprep.mubr.msk.bf16.mxu0 %vm4123_vm1, %v4122_v8 }
 0xdd4   : > { %v1793_v3 = vpop.f32.mrf.mxu0 }
 0xdd5   : > { %v4691_v4 = vpack.c.bf16 %v1793_v3, %v1793_v3 }
 0xdd6   : > { %v3257_v6 = vpop.f32.mrf.mxu0 }
 0xdd7   : > { %2030 = vrot.lane.b32.xlu1 %v4691_v4, %s4124_s30  ;;  %3278 = vmatmul.mubr.msk.bf16.vlgmr.msra.gmra.mxu1 %vm1074_vm3, %v4691_v4 }
 0xdd8   : > { %v1796_v7 = vpop.f32.mrf.mxu0  ;;  %3288 = vmatpush3.bf16.xpose.msra.mxu1 %v2039_v5  ;;  %3289 = vmatprep.mubr.msk.bf16.mxu1 %vm4123_vm1, %v4122_v8 }
 0xdd9   : > { %3299 = vmatprep.subr.bf16.mxu1 %v4122_v8 }
 0xdda   : > { %v3258_v9 = vpop.f32.mrf.mxu0 }
 0xddc   : > { %v1914_v30 = vpop.f32.mrf.mxu0 }
 0xddd   : > { %v4712_v32 = vpack.c.bf16 %v1914_v30, %v1914_v30 }
 0xdde   : > { %v3273_v33 = vpop.f32.mrf.mxu0 }
 0xddf   : > { %v1985_v35 = vsel %vm1136_vm2, %v4712_v32, 0 }
 0xde0   : > { %v1917_v36 = vpop.f32.mrf.mxu0  ;;  %3282 = vmatpush3.bf16.msra.mxu0 %v1985_v35 }
 0xde1   : > { %3293 = vmatprep.subr.bf16.mxu0 %v4122_v8 }
 0xde2   : > { %v3274_v37 = vpop.f32.mrf.mxu0 }
 0xe49   : > { %v2031_v13 = vpop.permute.xlu1 %2030 }
 0xe4a   : > { %3290 = vmatmul.mubr.msk.bf16.vlgmr.msra.gmra.mxu1 %vm1074_vm3, %v2031_v13 }
 0xe4b   : > { %3301 = vmatprep.mubr.msk.bf16.mxu1 %vm4123_vm1, %v4122_v8  ;;  %3300 = vmatpush3.bf16.msra.mxu1 %v2149_v49 }
 0xe4c   : > { %3311 = vmatprep.subr.bf16.mxu1 %v4122_v8 }
 0xe97   : > { %v1963_v14 = vpop.f32.mrf.mxu1 }
 0xe98   : > { %v1969_v15 = vsel %vm1074_vm3, %v1963_v14, -inf }
 0xe99   : > { %1970 = vmax.xlane.f32.xlu1 %v1969_v15  ;;  %v3279_v31 = vpop.f32.mrf.mxu1 }
 0xe9b   : > { %v1966_v16 = vpop.f32.mrf.mxu1 }
 0xe9d   : > { %v3280_v17 = vpop.f32.mrf.mxu1 }
 0xf0a   : > { %v2075_v19 = vpop.f32.mrf.mxu1 }
 0xf0b   : > { %v2081_v20 = vsel %vm1074_vm3, %v2075_v19, -inf }
 0xf0c   : > { %2082 = vmax.xlane.f32.xlu0 %v2081_v20  ;;  %v3291_v21 = vpop.f32.mrf.mxu1 }
 0xf0e   : > { %v2078_v22 = vpop.f32.mrf.mxu1 }
 0xf10   : > { %v3292_v23 = vpop.f32.mrf.mxu1 }
 0xf22   : > { %v1971_v24 = vpop.xlane.xlu1 %1970  ;;  %2094 = vrot.lane.b32.xlu0 %v4712_v32, %s4124_s30  ;;  %s2755_s30 = sshll.u32 %s899_s8, 4  ;;  %s4821_s30 = int_to_ptr.vmem [resolvable:$true] %s2755_s30 }
 0xf23   : > { %v1972_v25 = vsub.f32 %v1963_v14, %v1971_v24  ;;  %s4011_s4 = scalar_lea.vmem %s4821_s30, 128  ;;  %p4018_p5 = scmp.lt.s32.totalorder %s4821_s30, %s4016_s6 }
 0xf24   : > { %p4012_p13 = scmp.ne.s32.totalorder %s4821_s30, %s4011_s4  ;;  %p4019_p8 = scmp.lt.s32.totalorder %s4017_s22, %s4011_s4 }
 0xf25   : > { %v1973_v27 = vmul.f32 1.442695, %v1972_v25 }
 0xf26   : > { %p4013_p7 = pnand %p4012_p13, %p4951_p1  ;;  %p4020_p9 = por %p4019_p8, %p4018_p5 }
 0xf27   : > { %3601 = vpow2.f32 %v1973_v27 }
 0xf28   : > { %p4014_p2 = pneg %p4013_p7 }
 0xf2a   : > { %p4021_p11 = pnand %p4020_p9, %p4014_p2 }
 0xf34   : > { %v3602_v28 = vpop.eup %3601 }
 0xf35   : > { %v1975_v29 = vsel %vm1074_vm3, %v3602_v28, 0.0 }
 0xf36   : > { %1976 = vadd.xlane.f32.xlu1 %v1975_v29 }
 0xf95   : > { %v2083_v38 = vpop.xlane.xlu0 %2082 }
 0xf96   : > { %v2084_v39 = vsub.f32 %v2075_v19, %v2083_v38 }
 0xf98   : > { %v2085_v40 = vmul.f32 1.442695, %v2084_v39 }
 0xf99   : > { %v2095_v44 = vpop.permute.xlu0 %2094 }
 0xf9a   : > { %3603 = vpow2.f32 %v2085_v40  ;;  %v2100_v47 = vsel %vm1136_vm2, %v2095_v44, 0 }
 0xfa7   : > { %v3604_v41 = vpop.eup %3603 }
 0xfa8   : > { %v2087_v42 = vsel %vm1074_vm3, %v3604_v41, 0.0 }
 0xfa9   : > { %2088 = vadd.xlane.f32.xlu1 %v2087_v42 }
 0xfba   : > { %2239 = vrot.lane.b32.xlu1 %v4684_v61, %s4128_s9 }
 0xfbe   : > { %2237 = vrot.lane.b32.xlu1 %v4691_v4, %s4128_s9 }
 0xfbf   : > { %v1977_v0 = vpop.xlane.xlu1 %1976 }
 0xfc0   : > { %3605 = vrcp.f32 %v1977_v0 }
 0xfcd   : > { %v3606_v43 = vpop.eup %3605 }
 0xfce   : > { %v1979_v45 = vmul.f32 %v3606_v43, %v3602_v28 }
 0xfd0   : > { %v1980_v46 = vpack.c.bf16 %v1979_v45, %v1979_v45 }
 0xfd2   : > { %3284 = vmatmul.mubr.msk.bf16.vlgmr.msra.gmra.mxu0 %vm1074_vm3, %v1980_v46 }
 0xfd3   : > { %3294 = vmatpush3.bf16.msra.mxu0 %v2100_v47  ;;  %3295 = vmatprep.mubr.msk.bf16.mxu0 %vm4123_vm1, %v4122_v8 }
 0xfd4   : > { %3305 = vmatprep.subr.bf16.mxu0 %v4122_v8 }
0x1032   : > { %v2089_v50 = vpop.xlane.xlu1 %2088 }
0x1033   : > { %3607 = vrcp.f32 %v2089_v50 }
0x1036   : > { %v2240_v60 = vpop.permute.xlu1 %2239 }
0x1037   : > { %v2245_v18 = vsel %vm1074_vm3, %v2240_v60, 0 }
0x103a   : > { %v2238_v5 = vpop.permute.xlu1 %2237 }
0x1040   : > { %v3608_v51 = vpop.eup %3607 }
0x1041   : > { %v2091_v53 = vmul.f32 %v3608_v51, %v3604_v41 }
0x1043   : > { %v2092_v54 = vpack.c.bf16 %v2091_v53, %v2091_v53 }
0x1045   : > { %3296 = vmatmul.mubr.msk.bf16.vlgmr.msra.gmra.mxu0 %vm1074_vm3, %v2092_v54  ;;  %v2509_v54 = vld [vmem:[#allocation19 + $0xc] sm:$0xf] }
0x1046   : > { %3306 = vmatpush3.bf16.msra.mxu0 %v2195_v55  ;;  %3307 = vmatprep.mubr.msk.bf16.mxu0 %vm4123_vm1, %v4122_v8 }
0x1047   : > { %3317 = vmatprep.subr.bf16.mxu0 %v4122_v8 }
0x1092   : > { %v2021_v56 = vpop.f32.mrf.mxu0 }
0x1093   : > { %v2027_v26 = vpack.c.bf16 %v2021_v56, %v2021_v56  ;;  %v2514_v56 = vsel %vm1136_vm2, %v2509_v54, 0 }
0x1094   : > { %v3285_v57 = vpop.f32.mrf.mxu0 }
0x1095   : > { %3308 = vmatmul.mubr.msk.bf16.vlgmr.msra.gmra.mxu0 %vm1074_vm3, %v2027_v26 }
0x1096   : > { %v2024_v58 = vpop.f32.mrf.mxu0  ;;  %3319 = vmatprep.mubr.msk.bf16.mxu0 %vm4123_vm1, %v4122_v8 }
0x1098   : > { %v3286_v59 = vpop.f32.mrf.mxu0 }
0x1105   : > { %v2136_v62 = vpop.f32.mrf.mxu0 }
0x1106   : > { %v2142_v63 = vpack.c.bf16 %v2136_v62, %v2136_v62 }
0x1107   : > { %v3297_v1 = vpop.f32.mrf.mxu0 }
0x1108   : > { %3302 = vmatmul.mubr.msk.bf16.vlgmr.msra.gmra.mxu1 %vm1074_vm3, %v2142_v63 }
0x1109   : > { %3312 = vmatpush3.bf16.xpose.msra.mxu1 %v2245_v18  ;;  %v2139_v2 = vpop.f32.mrf.mxu0  ;;  %3313 = vmatprep.mubr.msk.bf16.mxu1 %vm4123_vm1, %v4122_v8 }
0x110a   : > { %3323 = vmatprep.subr.bf16.mxu1 %v4122_v8 }
0x110b   : > { %v3298_v3 = vpop.f32.mrf.mxu0 }
0x1110   : > { %3314 = vmatmul.mubr.msk.bf16.vlgmr.msra.gmra.mxu1 %vm1074_vm3, %v2238_v5 }
0x1111   : > { %3325 = vmatprep.mubr.msk.bf16.mxu1 %vm4123_vm1, %v4122_v8 }
0x1155   : > { %v4747_v6 = vpop.f32.mrf.mxu0 }
0x1157   : > { %v3309_v7 = vpop.f32.mrf.mxu0 }
0x1159   : > { %v2234_v9 = vpop.f32.mrf.mxu0 }
0x115b   : > { %v3310_v10 = vpop.f32.mrf.mxu0 }
0x11c8   : > { %v4749_v11 = vpop.f32.mrf.mxu1 }
0x11c9   : > { %v2232_v52 = vadd.f32 %v4747_v6, %v4749_v11 }
0x11ca   : > { %v3303_v12 = vpop.f32.mrf.mxu1 }
0x11cc   : > { %v2188_v13 = vpop.f32.mrf.mxu1 }
0x11ce   : > { %v3304_v14 = vpop.f32.mrf.mxu1 }
0x11d0   : > { %v2281_v15 = vpop.f32.mrf.mxu1 }
0x11d1   : > { %v2287_v31 = vsel %vm1074_vm3, %v2281_v15, -inf }
0x11d2   : > { %2288 = vmax.xlane.f32.xlu0 %v2287_v31  ;;  %v3315_v16 = vpop.f32.mrf.mxu1 }
0x11d4   : > { %v2284_v17 = vpop.f32.mrf.mxu1 }
0x11d6   : > { %v3316_v19 = vpop.f32.mrf.mxu1 }
0x11e8   : > { %2299 = vrot.lane.b32.xlu0 %v4712_v32, %s4128_s9 }
0x11ec   : > { %2397 = vrot.lane.b32.xlu0 %v4691_v4, %s4129_s10 }
0x125b   : > { %v2289_v20 = vpop.xlane.xlu0 %2288 }
0x125c   : > { %v2290_v21 = vsub.f32 %v2281_v15, %v2289_v20  ;;  %v3575_v20 = vld [vmem:[#allocation23 + $0x8] sm:$0xff]  }
0x125e   : > { %v2291_v22 = vmul.f32 1.442695, %v2290_v21  ;;  %v3576_v21 = vld [vmem:[#allocation23] sm:$0xff]  }
0x125f   : > { %v2300_v23 = vpop.permute.xlu0 %2299 }
0x1260   : > { %3609 = vpow2.f32 %v2291_v22  ;;  %v2305_v24 = vsel %vm1136_vm2, %v2300_v23, 0  ;;  %v3578_v22 = vld [vmem:[%s4948_s7 + $0x10] sm:$0xff]  }
0x1261   : > { %3318 = vmatpush3.bf16.msra.mxu0 %v2305_v24 }
0x1262   : > { %3329 = vmatprep.subr.bf16.mxu0 %v4122_v8 }
0x1263   : > { %v2398_v36 = vpop.permute.xlu0 %2397 }
0x126d   : > { %v3610_v25 = vpop.eup %3609 }
0x126e   : > { %v2293_v27 = vsel %vm1074_vm3, %v3610_v25, 0.0 }
0x126f   : > { %2294 = vadd.xlane.f32.xlu1 %v2293_v27 }
0x1280   : > { %2399 = vrot.lane.b32.xlu1 %v4684_v61, %s4129_s10  ;;  %v2349_v61 = vld [vmem:[#allocation19 + $0x8] sm:$0xf] }
0x1281   : > { %v2354_v37 = vsel %vm1136_vm2, %v2349_v61, 0  ;;  %v3580_v61 = vld [vmem:[%s4948_s7] sm:$0xff]  }
0x1282   : > { %3324 = vmatpush3.bf16.msra.mxu1 %v2354_v37  ;;  %v3078_v37 = vld [vmem:[#allocation25] ss:$0 sm:$0xff] }
0x1283   : > { %3335 = vmatprep.subr.bf16.mxu1 %v4122_v8 }
0x12f8   : > { %v2295_v28 = vpop.xlane.xlu1 %2294 }
0x12f9   : > { %3611 = vrcp.f32 %v2295_v28  ;;  %v3076_v28 = vld [vmem:[#allocation20] ss:$0 sm:$0xff] }
0x12fc   : > { %v2400_v30 = vpop.permute.xlu1 %2399 }
0x12fd   : > { %v2405_v35 = vsel %vm1074_vm3, %v2400_v30, 0 }
0x1306   : > { %v3612_v4 = vpop.eup %3611 }
0x1307   : > { %v2297_v29 = vmul.f32 %v3612_v4, %v3610_v25 }
0x1309   : > { %v2298_v33 = vpack.c.bf16 %v2297_v29, %v2297_v29  ;;  %v3077_v29 = vld [vmem:[#allocation22] ss:$0 sm:$0xff] }
0x130b   : > { %3320 = vmatmul.mubr.msk.bf16.vlgmr.msra.gmra.mxu0 %vm1074_vm3, %v2298_v33 }
0x130c   : > { %3330 = vmatpush3.bf16.xpose.msra.mxu0 %v2405_v35  ;;  %3331 = vmatprep.mubr.msk.bf16.mxu0 %vm4123_vm1, %v4122_v8 }
0x130d   : > { %3341 = vmatprep.subr.bf16.mxu0 %v4122_v8 }
0x1313   : > { %3332 = vmatmul.mubr.msk.bf16.vlgmr.msra.gmra.mxu0 %vm1074_vm3, %v2398_v36  ;;  %v3579_v36 = vld [vmem:[%s4948_s7 + $0x8] sm:$0xff]  }
0x1314   : > { %3343 = vmatprep.mubr.msk.bf16.mxu0 %vm4123_vm1, %v4122_v8  ;;  %3342 = vmatpush3.bf16.msra.mxu0 %v2514_v56 }
0x1315   : > { %3355 = vmatprep.subr.bf16.mxu0 %v4122_v8 }
0x13cb   : > { %v2341_v38 = vpop.f32.mrf.mxu0 }
0x13cc   : > { %v2347_v39 = vpack.c.bf16 %v2341_v38, %v2341_v38 }
0x13cd   : > { %v3321_v40 = vpop.f32.mrf.mxu0 }
0x13ce   : > { %3326 = vmatmul.mubr.msk.bf16.vlgmr.msra.gmra.mxu1 %vm1074_vm3, %v2347_v39 }
0x13cf   : > { %v2344_v41 = vpop.f32.mrf.mxu0  ;;  %3337 = vmatprep.mubr.msk.bf16.mxu1 %vm4123_vm1, %v4122_v8 }
0x13d1   : > { %v3322_v42 = vpop.f32.mrf.mxu0 }
0x13d3   : > { %v2441_v0 = vpop.f32.mrf.mxu0 }
0x13d4   : > { %v2447_v43 = vsel %vm1074_vm3, %v2441_v0, -inf }
0x13d5   : > { %2448 = vmax.xlane.f32.xlu1 %v2447_v43  ;;  %v3333_v44 = vpop.f32.mrf.mxu0 }
0x13d7   : > { %v2444_v45 = vpop.f32.mrf.mxu0 }
0x13d9   : > { %v3334_v46 = vpop.f32.mrf.mxu0 }
0x145e   : > { %v2449_v47 = vpop.xlane.xlu1 %2448 }
0x145f   : > { %v2450_v48 = vsub.f32 %v2441_v0, %v2449_v47 }
0x1461   : > { %v2451_v49 = vmul.f32 1.442695, %v2450_v48 }
0x1463   : > { %3613 = vpow2.f32 %v2451_v49 }
0x1470   : > { %v3614_v50 = vpop.eup %3613 }
0x1471   : > { %v2453_v51 = vsel %vm1074_vm3, %v3614_v50, 0.0 }
0x1472   : > { %2454 = vadd.xlane.f32.xlu0 %v2453_v51 }
0x1488   : > { %2459 = vrot.lane.b32.xlu0 %v4712_v32, %s4129_s10  ;;  %s4950_s10 = sld [smem:[#allocation52_spill]] }
0x148e   : > { %v2390_v53 = vpop.f32.mrf.mxu1  ;;  %s4819_s0 = scalar_lea.hbm %s4950_s10, %s3089_s14 }
0x148f   : > { %v2396_v55 = vadd.f32 %v2390_v53, %v2232_v52 }
0x1490   : > { %v3327_v26 = vpop.f32.mrf.mxu1 }
0x1492   : > { %v2393_v57 = vpop.f32.mrf.mxu1 }
0x1494   : > { %v3328_v58 = vpop.f32.mrf.mxu1 }
0x14fb   : > { %v2455_v59 = vpop.xlane.xlu0 %2454 }
0x14fc   : > { %3615 = vrcp.f32 %v2455_v59 }
0x14ff   : > { %v2460_v60 = vpop.permute.xlu0 %2459 }
0x1500   : > { %v2465_v62 = vsel %vm1136_vm2, %v2460_v60, 0 }
0x1501   : > { %3336 = vmatpush3.bf16.msra.mxu1 %v2465_v62 }
0x1502   : > { %3347 = vmatprep.subr.bf16.mxu1 %v4122_v8 }
0x1509   : > { %v3616_v32 = vpop.eup %3615 }
0x150a   : > { %v2457_v63 = vmul.f32 %v3616_v32, %v3614_v50 }
0x150c   : > { %v2458_v1 = vpack.c.bf16 %v2457_v63, %v2457_v63 }
0x150e   : > { %3338 = vmatmul.mubr.msk.bf16.vlgmr.msra.gmra.mxu1 %vm1074_vm3, %v2458_v1 }
0x150f   : > { %3351 = vmatprep.mubr.msk.bf16.mxu1 %vm4123_vm1, %v4122_v8  ;;  %3348 = vmatpush3.bf16.msra.mxu1 %v3575_v20 }
0x1510   : > { %3349 = vmatprep.subr.bf16.mxu1 %v4122_v8 }
0x1513   : > { %3350 = vmatpush3.bf16.msra.mxu1 %v3576_v21 }
0x15ce   : > { %v2501_v18 = vpop.f32.mrf.mxu1 }
0x15cf   : > { %v2507_v2 = vpack.c.bf16 %v2501_v18, %v2501_v18 }
0x15d0   : > { %v3339_v3 = vpop.f32.mrf.mxu1 }
0x15d1   : > { %3344 = vmatmul.mubr.msk.bf16.vlgmr.msra.gmra.mxu0 %vm1074_vm3, %v2507_v2 }
0x15d2   : > { %v2504_v5 = vpop.f32.mrf.mxu1  ;;  %3363 = vmatprep.mubr.msk.bf16.mxu0 %vm4123_vm1, %v4122_v8 }
0x15d4   : > { %v3340_v6 = vpop.f32.mrf.mxu1 }
0x1691   : > { %v2550_v7 = vpop.f32.mrf.mxu0 }
0x1692   : > { %v2556_v9 = vadd.f32 %v2550_v7, %v2396_v55 }
0x1693   : > { %v3345_v10 = vpop.f32.mrf.mxu0 }
0x1694   : > { %v2557_v11 = vadd.f32 %v2556_v9, %v4656_v34  ;;  %v3577_v34 = vld [vmem:[%s4948_s7 + $0x18] sm:$0xff]  }
0x1695   : > { %v2553_v12 = vpop.f32.mrf.mxu0  ;;  %3356 = vmatpush3.bf16.msra.mxu0 %v3577_v34 }
0x1696   : > { %v2560_v13 = vsel %vm919_vm0, %v2557_v11, 0.0  ;;  %3357 = vmatprep.subr.bf16.mxu0 %v4122_v8 }
0x1697   : > { %2561 = vadd.xlane.f32.xlu1 %v2560_v13  ;;  %v3346_v14 = vpop.f32.mrf.mxu0 }
0x1699   : > { %3358 = vmatpush3.bf16.msra.mxu0 %v3578_v22 }
0x169a   : > { %3359 = vmatprep.subr.bf16.mxu0 %v4122_v8 }
0x169d   : > { %3360 = vmatpush3.bf16.msra.mxu0 %v3579_v36 }
0x169e   : > { %3361 = vmatprep.subr.bf16.mxu0 %v4122_v8  ;;  %v3082_v8 = vld [vmem:[%s4949_s24] ss:$0 sm:$0xff] }
0x16a1   : > { %3362 = vmatpush3.bf16.msra.mxu0 %v3580_v61 }
0x1720   : > { %v2562_v15 = vpop.xlane.xlu1 %2561 }
0x1721   : > { %v2563_v31 = vmul.f32 0.03125, %v2562_v15 }
0x1723   : > { %v2564_v16 = vsub.f32 %v2557_v11, %v2563_v31 }
0x1725   : > { %v2565_v17 = vmul.f32 %v2564_v16, %v2564_v16 }
0x1727   : > { %v2566_v19 = vsel %vm919_vm0, %v2565_v17, 0.0 }
0x1728   : > { %2567 = vadd.xlane.f32.xlu1 %v2566_v19 }
0x17b1   : > { %v2568_v23 = vpop.xlane.xlu1 %2567 }
0x17b2   : > { %v2569_v24 = vmul.f32 0.03125, %v2568_v23 }
0x17b4   : > { %v2570_v25 = vadd.f32 1e-07, %v2569_v24 }
0x17b6   : > { %3617 = vrsqrt.f32 %v2570_v25 }
0x17c3   : > { %v3618_v27 = vpop.eup %3617 }
0x17c4   : > { %v2572_v4 = vmul.f32 %v3618_v27, %v2564_v16 }
0x17c6   : > { %v2579_v30 = vmul.f32 %v3076_v28, %v2572_v4 }
0x17c8   : > { %v2586_v33 = vadd.f32 %v3077_v29, %v2579_v30 }
0x17ca   : > { %v2587_v35 = vpack.c.bf16 %v2586_v33, %v2586_v33 }
0x17cc   : > { %3352 = vmatmul.mubr.msk.bf16.vlgmr.msra.gmra.mxu1 %vm919_vm0, %v2587_v35 }
0x188c   : > { %v2648_v38 = vpop.f32.mrf.mxu1 }
0x188d   : > { %v2649_v39 = vadd.f32 %v3078_v37, %v2648_v38 }
0x188e   : > { %v3353_v40 = vpop.f32.mrf.mxu1 }
0x188f   : > { %v2654_v41 = vmax.f32 %v2649_v39, 0.0 }
0x1890   : > { %v2651_v42 = vpop.f32.mrf.mxu1 }
0x1891   : > { %v2655_v0 = vpack.c.bf16 %v2654_v41, %v2654_v41 }
0x1892   : > { %v3354_v43 = vpop.f32.mrf.mxu1 }
0x1893   : > { %3364 = vmatmul.mubr.msk.bf16.vlgmr.msra.gmra.mxu0 %vm2695_vm4, %v2655_v0 }
0x1953   : > { %v2733_v44 = vpop.f32.mrf.mxu0 }
0x1954   : > { %v2734_v45 = vadd.f32 %v3082_v8, %v2733_v44 }
0x1955   : > { %v3365_v46 = vpop.f32.mrf.mxu0 }
0x1956   : > { %v2739_v47 = vadd.f32 %v2734_v45, %v2557_v11 }
0x1957   : > { %v2736_v48 = vpop.f32.mrf.mxu0 }
0x1958   : > { %2740 = vst.msk [vmem:[%s899_s8] sm:$0xff] %vm919_vm0, %v2739_v47 }
0x1959   : > { %v3366_v49 = vpop.f32.mrf.mxu0 }
0x195a   : > { %4024 = shalt.err (!%p4021_p11)
}
0x195b   : > { %s4025_s19 = scalar_lea.hbm %s4819_s0, 128  ;;  %s4029_s24 = scalar_lea.hbm %s4950_s10, 256 }
0x195c   : > { %p4026_p10 = scmp.ne.s32.totalorder %s4819_s0, %s4025_s19  ;;  %p4030_p0 = scmp.lt.s32.totalorder %s4819_s0, %s4950_s10 }
0x195d   : > { %p4031_p6 = scmp.lt.s32.totalorder %s4029_s24, %s4025_s19 }
0x195e   : > { %p4027_p3 = pnand %p4026_p10, %p4951_p1 }
0x195f   : > { %p4032_p12 = por %p4031_p6, %p4030_p0 }
0x1960   : > { %p4028_p4 = pneg %p4027_p3 }
0x1962   : > { %p4033_p13 = pnand %p4032_p12, %p4028_p4 }
0x1964   : > { %4036 = shalt.err (!%p4033_p13)
}
0x1965   : > { %3425 = dma.vmem_to_hbm [thread:$0]  (%p4951_p1), %s4821_s30, 128, %s4819_s0, %s2742_s29  }
0x1966 PF: > { %s2767_s13 = sand.u32 1, %s4091_s2   ;;  %p4952_p7 = scmp.ne.s32.totalorder %s4926_s20, 0 }
0x1967   : > { %p4953_p2 = scmp.ge.s32.totalorder %s4103_s27, 2  ;;  %s2768_s9 = scalar_lea.sflag [#allocation4], %s2767_s13 }
0x1969   : > { %p3475_p5 = pnand %p4953_p2, %p4952_p7 }
0x196b   : > { %p3476_p8 = pneg %p3475_p5 }
0x196d   : > { %4086 = dma.done.wait (%p3476_p8), %s2768_s9, 128  }
0x196e   : > { %4088 = vsyncadd (%p3476_p8), %s2768_s9, 4294967168  ;;  %p41_p9 = scmp.ge.s32.totalorder %s4422_s5, 4   ;;  %s4954_s2 = smov %s4095_s25 }
0x196f   : > { %s4955_s25 = smov %s4099_s26  ;;  %s4956_s26 = smov %s4433_s21 }
0x1970   : > { %s4957_s27 = smov %s4422_s5  ;;  %43 = sbr.rel (!%p41_p9) target bundleno = 30 (0x1e), region = 220 }
0x1975   :  { %2773 = vsyncpa [#allocation3], 1 }
0x1976   :  { %2775 = vsyncpa [#allocation3 + $0x1], 1 }
0x1977   :  { %2776 = vsyncpa [#allocation6], 1 }
0x1978   :  { %2777 = vsyncpa [#allocation9], 1 }
0x1979   :  { %2778 = vsyncpa [#allocation12], 1 }
0x197a   :  { %2779 = vsyncpa [#allocation15], 1 }
0x197b   :  { %2780 = vsyncpa [#allocation18], 1 }
0x197c   :  { %2781 = vsyncpa [#allocation21], 1 }
0x197d   :  { %2782 = vsyncpa [#allocation24], 1 }
0x197e   :  { %2783 = vsyncpa [#allocation4], 1 }
0x197f   :  { %2785 = vsyncpa [#allocation4 + $0x1], 1 }

</bundles_post_ra>
